<compile_context>
chip_gen: v7x
topology: tpu7x:2x2x1
jax: 0.10.0
libtpu: 0.0.40
codegen_flags: <defaults>
</compile_context>

<pallas_src>
import functools

import jax
import jax.numpy as jnp
from jax.experimental import pallas as pl
from jax.experimental.pallas import tpu as pltpu

NEG_SLOPE = 0.01  # torch.nn.LeakyReLU default negative_slope
LANE = 128


def _round_up(x, m):
    return ((x + m - 1) // m) * m


def _choose_tile_b(batch, max_tile=512):
    """Batch tile: multiple of 8, <= max_tile, >= 2 grid steps when possible."""
    tb = min(max_tile, _round_up(batch, 8))
    # Ensure at least 2 grid steps along the "parallel" axis when the batch
    # allows it, so both v7x TensorCores get work (no effect on v5e/v6e).
    if batch > 8 and _round_up(batch, tb) // tb < 2:
        tb = _round_up(pl.cdiv(batch, 2), 8)
    return max(tb, 8)


def _autoencoder_kernel(x_ref, w_ref, b_ref, out_ref, *, act_flags):
    """Fused MLP chain on one batch tile.

    x_ref   : (tile_b, P)        f32   padded input tile
    w_ref   : (n_layers, P, P)   bf16  stacked, pre-transposed, zero-padded W
    b_ref   : (n_layers, 1, P)   f32   stacked, zero-padded biases
    out_ref : (tile_b, P)        f32   padded output tile
    """
    h = x_ref[...].astype(jnp.float32)
    for i, act in enumerate(act_flags):
        w = w_ref[i]                        # (P, P) bf16 -> one clean MXU tile
        b = b_ref[i].astype(jnp.float32)    # (1, P) f32
        # bf16 operands, f32 accumulation (native MXU path).
        h = jnp.dot(h.astype(jnp.bfloat16), w,
                    preferred_element_type=jnp.float32) + b
        if act:
            h = jnp.where(h > 0, h, NEG_SLOPE * h)   # LeakyReLU (f32 epilogue)
        # Dropout(p=0.0) is the identity -> elided.
    out_ref[...] = h.astype(out_ref.dtype)


def init_autoencoder_params(key, in_channels, hidden_channels, latent_channels):
    """PyTorch-Linear-style init. Returns (layers, act_flags).

    layers: list of (W, b) with torch shapes W=(out, in), b=(out,).
    act_flags[i] is True iff layer i is followed by LeakyReLU.
    """
    enc_dims = [in_channels] + list(hidden_channels) + [latent_channels]
    dec_dims = [latent_channels] + list(hidden_channels[::-1]) + [in_channels]
    dims = (list(zip(enc_dims[:-1], enc_dims[1:]))
            + list(zip(dec_dims[:-1], dec_dims[1:])))
    act_flags = ([True] * len(hidden_channels) + [False]) * 2

    layers = []
    for (fan_in, fan_out) in dims:
        key, kw, kb = jax.random.split(key, 3)
        bound = 1.0 / (fan_in ** 0.5)
        w = jax.random.uniform(kw, (fan_out, fan_in), jnp.float32, -bound, bound)
        b = jax.random.uniform(kb, (fan_out,), jnp.float32, -bound, bound)
        layers.append((w, b))
    return layers, tuple(act_flags)


def _pack_params(layers, pad_w):
    """Transpose to (in,out), zero-pad to (pad_w,pad_w), stack; bf16 weights."""
    ws, bs = [], []
    for (w, b) in layers:
        out_f, in_f = w.shape
        wt = jnp.zeros((pad_w, pad_w), jnp.float32).at[:in_f, :out_f].set(w.T)
        bb = jnp.zeros((1, pad_w), jnp.float32).at[0, :out_f].set(b)
        ws.append(wt)
        bs.append(bb)
    w_stack = jnp.stack(ws).astype(jnp.bfloat16)   # (L, P, P) bf16
    b_stack = jnp.stack(bs)                        # (L, 1, P) f32
    return w_stack, b_stack


def autoencoder_forward(x, layers, act_flags, *, tile_b=None, max_tile=512):
    """x: (batch, in_channels) f32. Returns reconstruction (batch, in_channels)."""
    batch, in_ch = x.shape
    n_layers = len(layers)
    # Common padded feature width (all dims here are <= 128 -> pad_w == 128).
    dims = [in_ch] + [w.shape[0] for (w, _) in layers]
    pad_w = _round_up(max(dims), LANE)

    w_stack, b_stack = _pack_params(layers, pad_w)

    if tile_b is None:
        tile_b = _choose_tile_b(batch, max_tile)
    batch_p = _round_up(batch, tile_b)
    grid = (batch_p // tile_b,)

    # Zero-pad batch (to tile multiple) and features (to lane-dense width).
    x_p = jnp.zeros((batch_p, pad_w), x.dtype).at[:batch, :in_ch].set(x)

    kernel = functools.partial(_autoencoder_kernel, act_flags=tuple(act_flags))

    itemsize = jnp.dtype(x.dtype).itemsize
    param_bytes = w_stack.size * 2 + b_stack.size * 4
    # VMEM budget: double-buffered x/out tiles + params (worst case 2x) +
    # a few live f32 activation tiles, with ~2x headroom. Kept well under
    # v7x's 64 MiB and v5e's 16 MiB scoped default.
    io_bytes = 2 * 2 * tile_b * pad_w * itemsize
    live_bytes = 4 * tile_b * pad_w * 4
    vmem_limit = int(max(16 << 20,
                         min(2 * (io_bytes + 2 * param_bytes + live_bytes),
                             48 << 20)))

    cost = pl.CostEstimate(
        flops=2 * batch_p * n_layers * pad_w * pad_w,
        transcendentals=0,
        bytes_accessed=2 * batch_p * pad_w * itemsize + param_bytes,
    )

    out_p = pl.pallas_call(
        kernel,
        out_shape=jax.ShapeDtypeStruct((batch_p, pad_w), x.dtype),
        grid_spec=pltpu.PrefetchScalarGridSpec(
            num_scalar_prefetch=0,
            grid=grid,
            in_specs=[
                pl.BlockSpec((tile_b, pad_w), lambda i: (i, 0)),
                # Whole stacked parameter slabs, constant index -> resident in
                # VMEM, no per-step re-fetch.
                pl.BlockSpec(w_stack.shape, lambda i: (0, 0, 0)),
                pl.BlockSpec(b_stack.shape, lambda i: (0, 0, 0)),
            ],
            out_specs=pl.BlockSpec((tile_b, pad_w), lambda i: (i, 0)),
        ),
        compiler_params=pltpu.CompilerParams(
            dimension_semantics=("parallel",),
            vmem_limit_bytes=vmem_limit,
        ),
        cost_estimate=cost,
    )(x_p, w_stack, b_stack)

    return out_p[:batch, :in_ch]


def autoencoder_ref(x, layers, act_flags):
    """Pure-JAX reference (same bf16-operand / f32-accum math, no padding)."""
    h = x.astype(jnp.float32)
    for (w, b), act in zip(layers, act_flags):
        h = jnp.dot(h.astype(jnp.bfloat16), w.T.astype(jnp.bfloat16),
                    preferred_element_type=jnp.float32) + b.astype(jnp.float32)
        if act:
            h = jnp.where(h > 0, h, NEG_SLOPE * h)
    return h.astype(x.dtype)


if __name__ == "__main__":
    # Small shapes consistent with the module's forward. batch is deliberately
    # not a multiple of the batch tile to exercise the ragged-batch padding.
    batch = 200
    in_channels = 32
    hidden_channels = [64, 48]
    latent_channels = 16

    key = jax.random.PRNGKey(0)
    key, kx = jax.random.split(key)
    x = jax.random.normal(kx, (batch, in_channels), jnp.float32)

    layers, act_flags = init_autoencoder_params(
        key, in_channels, hidden_channels, latent_channels)

    out = jax.block_until_ready(autoencoder_forward(x, layers, act_flags))
    ref = jax.block_until_ready(autoencoder_ref(x, layers, act_flags))

    assert out.shape == (batch, in_channels)
    assert jnp.allclose(out, ref, atol=2e-2, rtol=2e-2), "mismatch vs reference"

    print("KERNEL_OK")
</pallas_src>

<mosaic_0001>
module attributes {stable_mosaic.version = 11 : i64} {
  func.func @_autoencoder_kernel(%arg0: i32, %arg1: memref<104x128xf32, #tpu.memory_space<vmem>>, %arg2: memref<6x128x128xbf16, #tpu.memory_space<vmem>>, %arg3: memref<6x1x128xf32, #tpu.memory_space<vmem>>, %arg4: memref<104x128xf32, #tpu.memory_space<vmem>>) attributes {dimension_semantics = [#tpu.dimension_semantics<parallel>], iteration_bounds = array<i64: 2>, scalar_prefetch = 0 : i64, scratch_operands = 0 : i64, tpu.core_type = #tpu.core_type<tc>, window_params = [{transform_indices = @transform_0, window_bounds = array<i64: 104, 128>}, {pipeline_mode = #tpu.pipeline_mode<synchronous>, transform_indices = @transform_1, window_bounds = array<i64: 6, 128, 128>}, {pipeline_mode = #tpu.pipeline_mode<synchronous>, transform_indices = @transform_2, window_bounds = array<i64: 6, 1, 128>}, {transform_indices = @transform_3, window_bounds = array<i64: 104, 128>}]} {
    %c0 = arith.constant 0 : index
    %c0_0 = arith.constant 0 : index
    %0 = vector.load %arg1[%c0, %c0_0] : memref<104x128xf32, #tpu.memory_space<vmem>>, vector<104x128xf32>
    %c0_1 = arith.constant 0 : index
    %c0_2 = arith.constant 0 : index
    %c0_3 = arith.constant 0 : index
    %1 = vector.load %arg2[%c0_1, %c0_2, %c0_3] : memref<6x128x128xbf16, #tpu.memory_space<vmem>>, vector<1x128x128xbf16>
    %2 = vector.shape_cast %1 : vector<1x128x128xbf16> to vector<128x128xbf16>
    %c0_4 = arith.constant 0 : index
    %c0_5 = arith.constant 0 : index
    %c0_6 = arith.constant 0 : index
    %3 = vector.load %arg3[%c0_4, %c0_5, %c0_6] : memref<6x1x128xf32, #tpu.memory_space<vmem>>, vector<1x1x128xf32>
    %4 = vector.shape_cast %3 : vector<1x1x128xf32> to vector<1x128xf32>
    %5 = arith.truncf %0 : vector<104x128xf32> to vector<104x128xbf16>
    %cst = arith.constant dense<0.000000e+00> : vector<104x128xf32>
    %6 = tpu.matmul %5, %2, %cst {dimension_numbers = #tpu.dot_dimension_numbers<[1], [0], [0], [1], [0, 0, 1, 1], [], []>} : vector<104x128xbf16>, vector<128x128xbf16>, vector<104x128xf32> -> vector<104x128xf32>
    %7 = vector.broadcast %4 : vector<1x128xf32> to vector<104x128xf32>
    %8 = arith.addf %6, %7 : vector<104x128xf32>
    %cst_7 = arith.constant 0.000000e+00 : f32
    %9 = vector.broadcast %cst_7 : f32 to vector<104x128xf32>
    %10 = arith.cmpf ogt, %8, %9 : vector<104x128xf32>
    %cst_8 = arith.constant 0.00999999977 : f32
    %11 = vector.broadcast %cst_8 : f32 to vector<104x128xf32>
    %12 = arith.mulf %11, %8 : vector<104x128xf32>
    %13 = arith.select %10, %8, %12 : vector<104x128xi1>, vector<104x128xf32>
    %c1 = arith.constant 1 : index
    %c0_9 = arith.constant 0 : index
    %c0_10 = arith.constant 0 : index
    %14 = vector.load %arg2[%c1, %c0_9, %c0_10] : memref<6x128x128xbf16, #tpu.memory_space<vmem>>, vector<1x128x128xbf16>
    %15 = vector.shape_cast %14 : vector<1x128x128xbf16> to vector<128x128xbf16>
    %c1_11 = arith.constant 1 : index
    %c0_12 = arith.constant 0 : index
    %c0_13 = arith.constant 0 : index
    %16 = vector.load %arg3[%c1_11, %c0_12, %c0_13] : memref<6x1x128xf32, #tpu.memory_space<vmem>>, vector<1x1x128xf32>
    %17 = vector.shape_cast %16 : vector<1x1x128xf32> to vector<1x128xf32>
    %18 = arith.truncf %13 : vector<104x128xf32> to vector<104x128xbf16>
    %cst_14 = arith.constant dense<0.000000e+00> : vector<104x128xf32>
    %19 = tpu.matmul %18, %15, %cst_14 {dimension_numbers = #tpu.dot_dimension_numbers<[1], [0], [0], [1], [0, 0, 1, 1], [], []>} : vector<104x128xbf16>, vector<128x128xbf16>, vector<104x128xf32> -> vector<104x128xf32>
    %20 = vector.broadcast %17 : vector<1x128xf32> to vector<104x128xf32>
    %21 = arith.addf %19, %20 : vector<104x128xf32>
    %cst_15 = arith.constant 0.000000e+00 : f32
    %22 = vector.broadcast %cst_15 : f32 to vector<104x128xf32>
    %23 = arith.cmpf ogt, %21, %22 : vector<104x128xf32>
    %cst_16 = arith.constant 0.00999999977 : f32
    %24 = vector.broadcast %cst_16 : f32 to vector<104x128xf32>
    %25 = arith.mulf %24, %21 : vector<104x128xf32>
    %26 = arith.select %23, %21, %25 : vector<104x128xi1>, vector<104x128xf32>
    %c2 = arith.constant 2 : index
    %c0_17 = arith.constant 0 : index
    %c0_18 = arith.constant 0 : index
    %27 = vector.load %arg2[%c2, %c0_17, %c0_18] : memref<6x128x128xbf16, #tpu.memory_space<vmem>>, vector<1x128x128xbf16>
    %28 = vector.shape_cast %27 : vector<1x128x128xbf16> to vector<128x128xbf16>
    %c2_19 = arith.constant 2 : index
    %c0_20 = arith.constant 0 : index
    %c0_21 = arith.constant 0 : index
    %29 = vector.load %arg3[%c2_19, %c0_20, %c0_21] : memref<6x1x128xf32, #tpu.memory_space<vmem>>, vector<1x1x128xf32>
    %30 = vector.shape_cast %29 : vector<1x1x128xf32> to vector<1x128xf32>
    %31 = arith.truncf %26 : vector<104x128xf32> to vector<104x128xbf16>
    %cst_22 = arith.constant dense<0.000000e+00> : vector<104x128xf32>
    %32 = tpu.matmul %31, %28, %cst_22 {dimension_numbers = #tpu.dot_dimension_numbers<[1], [0], [0], [1], [0, 0, 1, 1], [], []>} : vector<104x128xbf16>, vector<128x128xbf16>, vector<104x128xf32> -> vector<104x128xf32>
    %33 = vector.broadcast %30 : vector<1x128xf32> to vector<104x128xf32>
    %34 = arith.addf %32, %33 : vector<104x128xf32>
    %c3 = arith.constant 3 : index
    %c0_23 = arith.constant 0 : index
    %c0_24 = arith.constant 0 : index
    %35 = vector.load %arg2[%c3, %c0_23, %c0_24] : memref<6x128x128xbf16, #tpu.memory_space<vmem>>, vector<1x128x128xbf16>
    %36 = vector.shape_cast %35 : vector<1x128x128xbf16> to vector<128x128xbf16>
    %c3_25 = arith.constant 3 : index
    %c0_26 = arith.constant 0 : index
    %c0_27 = arith.constant 0 : index
    %37 = vector.load %arg3[%c3_25, %c0_26, %c0_27] : memref<6x1x128xf32, #tpu.memory_space<vmem>>, vector<1x1x128xf32>
    %38 = vector.shape_cast %37 : vector<1x1x128xf32> to vector<1x128xf32>
    %39 = arith.truncf %34 : vector<104x128xf32> to vector<104x128xbf16>
    %cst_28 = arith.constant dense<0.000000e+00> : vector<104x128xf32>
    %40 = tpu.matmul %39, %36, %cst_28 {dimension_numbers = #tpu.dot_dimension_numbers<[1], [0], [0], [1], [0, 0, 1, 1], [], []>} : vector<104x128xbf16>, vector<128x128xbf16>, vector<104x128xf32> -> vector<104x128xf32>
    %41 = vector.broadcast %38 : vector<1x128xf32> to vector<104x128xf32>
    %42 = arith.addf %40, %41 : vector<104x128xf32>
    %cst_29 = arith.constant 0.000000e+00 : f32
    %43 = vector.broadcast %cst_29 : f32 to vector<104x128xf32>
    %44 = arith.cmpf ogt, %42, %43 : vector<104x128xf32>
    %cst_30 = arith.constant 0.00999999977 : f32
    %45 = vector.broadcast %cst_30 : f32 to vector<104x128xf32>
    %46 = arith.mulf %45, %42 : vector<104x128xf32>
    %47 = arith.select %44, %42, %46 : vector<104x128xi1>, vector<104x128xf32>
    %c4 = arith.constant 4 : index
    %c0_31 = arith.constant 0 : index
    %c0_32 = arith.constant 0 : index
    %48 = vector.load %arg2[%c4, %c0_31, %c0_32] : memref<6x128x128xbf16, #tpu.memory_space<vmem>>, vector<1x128x128xbf16>
    %49 = vector.shape_cast %48 : vector<1x128x128xbf16> to vector<128x128xbf16>
    %c4_33 = arith.constant 4 : index
    %c0_34 = arith.constant 0 : index
    %c0_35 = arith.constant 0 : index
    %50 = vector.load %arg3[%c4_33, %c0_34, %c0_35] : memref<6x1x128xf32, #tpu.memory_space<vmem>>, vector<1x1x128xf32>
    %51 = vector.shape_cast %50 : vector<1x1x128xf32> to vector<1x128xf32>
    %52 = arith.truncf %47 : vector<104x128xf32> to vector<104x128xbf16>
    %cst_36 = arith.constant dense<0.000000e+00> : vector<104x128xf32>
    %53 = tpu.matmul %52, %49, %cst_36 {dimension_numbers = #tpu.dot_dimension_numbers<[1], [0], [0], [1], [0, 0, 1, 1], [], []>} : vector<104x128xbf16>, vector<128x128xbf16>, vector<104x128xf32> -> vector<104x128xf32>
    %54 = vector.broadcast %51 : vector<1x128xf32> to vector<104x128xf32>
    %55 = arith.addf %53, %54 : vector<104x128xf32>
    %cst_37 = arith.constant 0.000000e+00 : f32
    %56 = vector.broadcast %cst_37 : f32 to vector<104x128xf32>
    %57 = arith.cmpf ogt, %55, %56 : vector<104x128xf32>
    %cst_38 = arith.constant 0.00999999977 : f32
    %58 = vector.broadcast %cst_38 : f32 to vector<104x128xf32>
    %59 = arith.mulf %58, %55 : vector<104x128xf32>
    %60 = arith.select %57, %55, %59 : vector<104x128xi1>, vector<104x128xf32>
    %c5 = arith.constant 5 : index
    %c0_39 = arith.constant 0 : index
    %c0_40 = arith.constant 0 : index
    %61 = vector.load %arg2[%c5, %c0_39, %c0_40] : memref<6x128x128xbf16, #tpu.memory_space<vmem>>, vector<1x128x128xbf16>
    %62 = vector.shape_cast %61 : vector<1x128x128xbf16> to vector<128x128xbf16>
    %c5_41 = arith.constant 5 : index
    %c0_42 = arith.constant 0 : index
    %c0_43 = arith.constant 0 : index
    %63 = vector.load %arg3[%c5_41, %c0_42, %c0_43] : memref<6x1x128xf32, #tpu.memory_space<vmem>>, vector<1x1x128xf32>
    %64 = vector.shape_cast %63 : vector<1x1x128xf32> to vector<1x128xf32>
    %65 = arith.truncf %60 : vector<104x128xf32> to vector<104x128xbf16>
    %cst_44 = arith.constant dense<0.000000e+00> : vector<104x128xf32>
    %66 = tpu.matmul %65, %62, %cst_44 {dimension_numbers = #tpu.dot_dimension_numbers<[1], [0], [0], [1], [0, 0, 1, 1], [], []>} : vector<104x128xbf16>, vector<128x128xbf16>, vector<104x128xf32> -> vector<104x128xf32>
    %67 = vector.broadcast %64 : vector<1x128xf32> to vector<104x128xf32>
    %68 = arith.addf %66, %67 : vector<104x128xf32>
    %c0_45 = arith.constant 0 : index
    %c0_46 = arith.constant 0 : index
    %69 = vector.load %arg4[%c0_45, %c0_46] : memref<104x128xf32, #tpu.memory_space<vmem>>, vector<104x128xf32>
    tpu.vector_store %arg4[%c0_45, %c0_46], %68 {strides = array<i32>} : memref<104x128xf32, #tpu.memory_space<vmem>>, vector<104x128xf32>,
    return
  }
  func.func @transform_0(%arg0: i32) -> (i32, i32) {
    %c0_i32 = arith.constant 0 : i32
    %c0_i32_0 = arith.constant 0 : i32
    return %arg0, %c0_i32 : i32, i32
  }
  func.func @transform_1(%arg0: i32) -> (i32, i32, i32) {
    %c0_i32 = arith.constant 0 : i32
    %c0_i32_0 = arith.constant 0 : i32
    %c0_i32_1 = arith.constant 0 : i32
    %c0_i32_2 = arith.constant 0 : i32
    return %c0_i32, %c0_i32_0, %c0_i32_1 : i32, i32, i32
  }
  func.func @transform_2(%arg0: i32) -> (i32, i32, i32) {
    %c0_i32 = arith.constant 0 : i32
    %c0_i32_0 = arith.constant 0 : i32
    %c0_i32_1 = arith.constant 0 : i32
    %c0_i32_2 = arith.constant 0 : i32
    return %c0_i32, %c0_i32_0, %c0_i32_1 : i32, i32, i32
  }
  func.func @transform_3(%arg0: i32) -> (i32, i32) {
    %c0_i32 = arith.constant 0 : i32
    %c0_i32_0 = arith.constant 0 : i32
    return %arg0, %c0_i32 : i32, i32
  }
}

</mosaic_0001>

<bundles_post_ra>
// kernel: tpu_custom_call.1
= control target key start
LH: loop header
LB: loop body
LE: loop exit
PB: predicated region body
PF: predicated region fallthrough
CT: control target
= control target key end

     0   :  { %8 = vsyncpa [#allocation3], 0  ;;  %s2639_s0 = inlined_call_operand.hbm [shape: f32[208,128], index: 0, kind: input, shape index: {}]   ;;  %s2640_s1 = inlined_call_operand.hbm [shape: bf16[6,128,128], index: 1, kind: input, shape index: {}]   ;;  %s2641_s2 = inlined_call_operand.vmem [shape: f32[6,1,128], index: 2, kind: input, shape index: {}]   ;;  %s2642_s3 = inlined_call_operand.hbm [shape: f32[208,128], index: 3, kind: output, shape index: {}]  }
   0x1   :  { %10 = vsyncpa [#allocation3 + $0x1], 0 }
   0x2   :  { %11 = vsyncpa [#allocation6], 0 }
   0x3   :  { %12 = vsyncpa [#allocation4], 0 }
   0x4   :  { %14 = vsyncpa [#allocation4 + $0x1], 0  ;;  %s2193_s12 = smov 0   ;;  %s2195_s13 = smov 0  }
   0x5   :  { %s2197_s14 = smov 0   ;;  %s2199_s15 = smov 0  }
   0x6 LB: > { %s2214_s16 = sadd.s32 4294967295, %s2160_s15   ;;  %s1492_s17 = sadd.s32 4294967294, %s2160_s15   ;;  %s2160_s15 = sphi %s2199_s15, %s2662_s15   ;;  %s2156_s14 = sphi %s2197_s14, %s2661_s14   ;;  %s2152_s13 = sphi %s2195_s13, %s2660_s13   ;;  %s2148_s12 = sphi %s2193_s12, %s2659_s12  }
   0x7   : > { %p40_p0 = scmp.ne.s32.totalorder %s2152_s13, %s2148_s12  ;;  %p2643_p1 = scmp.eq.s32.totalorder %s2214_s16, 0 }
   0x8   : > { %p112_p3 = scmp.eq.s32.totalorder %s1492_s17, 1  ;;  %p1493_p5 = scmp.ge.s32.totalorder %s2160_s15, 1 }
   0x9   : > { %p2223_p4 = por %p2643_p1, %p40_p0  ;;  %p119_p7 = scmp.lt.s32.totalorder %s2160_s15, 3 }
   0xa   : > { %p2228_p6 = por %p112_p3, %p40_p0  ;;  %s2162_s21 = smov [#allocation5]  }
   0xb   : > { %s2646_s18 = scalar_select %p2223_p4, 1, 0 }
   0xc   : > { %s2647_s19 = scalar_select %p2228_p6, 1, 0 }
   0xd   : > { %p2233_p8 = pnand %p1493_p5, %p119_p7  ;;  %s131_s22 = sshll.u32 %s2162_s21, 4  ;;  %s2237_s22 = int_to_ptr.vmem [resolvable:$true] %s131_s22 }
   0xe   : > { %s2249_s24 = sadd.s32 1, %s2160_s15   ;;  %s27_s25 = sadd.s32 1, %s2156_s14 }
   0xf   : > { %s2648_s20 = scalar_select %p2233_p8, 1, 0 }
  0x10   : > { %p1927_p9 = pneg %p2233_p8  ;;  %s24_s26 = ssub.s32 %s2160_s15, %s2249_s24 }
  0x11   : > { %s2032_s29 = scalar_lea.hbm %s2640_s1, 6144 }
  0x12   : > { %p2244_p11 = pnand %p1927_p9, %p2643_p1  ;;  %p2033_p12 = scmp.ne.s32.totalorder %s2640_s1, %s2032_s29 }
  0x13   : > { %p2039_p5 = scmp.lt.u32.totalorder %s2032_s29, %s2640_s1 }
  0x14   : > { %p2034_p13 = pneg %p2244_p11 }
  0x16   : > { %p2035_p0 = pnand %p2034_p13, %p2033_p12 }
  0x18   : > { %p2036_p3 = pneg %p2035_p0 }
  0x1a   : > { %p2041_p7 = pnand %p2039_p5, %p2036_p3 }
  0x1c   : > { %2044 = shalt.err (!%p2041_p7)
}
  0x1d   : > { %s2045_s7 = scalar_lea.vmem %s2237_s22, 6144  ;;  %p2053_p2 = scmp.lt.s32.totalorder %s2237_s22, %s2237_s22 }
  0x1e   : > { %p2046_p9 = scmp.ne.s32.totalorder %s2237_s22, %s2045_s7  ;;  %p2054_p6 = scmp.lt.s32.totalorder %s2045_s7, %s2045_s7 }
  0x20   : > { %p2048_p10 = pnand %p2046_p9, %p2034_p13  ;;  %p2055_p4 = por %p2054_p6, %p2053_p2 }
  0x22   : > { %p2049_p1 = pneg %p2048_p10 }
  0x24   : > { %p2056_p8 = pnand %p2055_p4, %p2049_p1 }
  0x26   : > { %2059 = shalt.err (!%p2056_p8)
}
  0x27   : > { %s2163_s8 = smov 64   ;;  %s2164_s9 = smov 4  }
  0x28   : > { %1930 = dma.hbm_to_vmem [thread:$0]  (!%p2244_p11), %s2640_s1, 6144, %s2237_s22, [#allocation6], %s2163_s8, %s2163_s8, %s2164_s9  }
  0x29   : > { %p25_p2 = scmp.eq.s32.totalorder %s24_s26, 0  ;;  %p34_p1 = scmp.ne.s32.totalorder %s2156_s14, %s2152_s13 }
  0x2a   : > { %p35_p4 = scmp.eq.s32.totalorder %s2160_s15, 0  ;;  %p1940_p6 = scmp.lt.s32.totalorder %s2160_s15, 2 }
  0x2b   : > { %s2280_s17 = scalar_select %p25_p2, %s2156_s14, %s27_s25  }
  0x2c   : > { %p36_p8 = por %p35_p4, %p34_p1  ;;  %p2650_p10 = scmp.eq.s32.totalorder %s2214_s16, 1 }
  0x2d   : > { %s148_s27 = sand.u32 1, %s2156_s14   ;;  %s1561_s28 = smul.u32 1664, %s2160_s15 }
  0x2e   : > { %p2284_p12 = por %p2650_p10, %p34_p1  ;;  %s1917_s29 = smul.u32 104, %s148_s27 }
  0x2f   : > { %s2293_s4 = scalar_lea.hbm %s2639_s0, %s1561_s28  ;;  %p2295_p11 = pnand %p1940_p6, %p36_p8 }
  0x30   : > { %s152_s25 = scalar_lea.vmem [#allocation2], %s1917_s29  ;;  %s2301_s5 = scalar_lea.sflag [#allocation3], %s148_s27 }
  0x31   : > { %s159_s26 = sshll.u32 %s152_s25, 4  ;;  %s2060_s6 = scalar_lea.hbm %s2293_s4, 1664  ;;  %s2299_s26 = int_to_ptr.vmem [resolvable:$true] %s159_s26 }
  0x32   : > { %p2061_p13 = scmp.ne.s32.totalorder %s2293_s4, %s2060_s6  ;;  %p2062_p0 = pneg %p2295_p11 }
  0x33   : > { %s2065_s9 = scalar_lea.hbm %s2639_s0, 3328  ;;  %p2066_p7 = scmp.lt.u32.totalorder %s2293_s4, %s2639_s0 }
  0x34   : > { %p2063_p3 = pnand %p2062_p0, %p2061_p13  ;;  %p2067_p9 = scmp.lt.u32.totalorder %s2065_s9, %s2060_s6 }
  0x35   : > { %p2069_p1 = scmp.lt.u32.totalorder %s2060_s6, %s2293_s4 }
  0x36   : > { %p2064_p5 = pneg %p2063_p3  ;;  %p2068_p2 = por %p2067_p9, %p2066_p7 }
  0x38   : > { %p2070_p4 = por %p2069_p1, %p2068_p2 }
  0x3a   : > { %p2071_p6 = pnand %p2070_p4, %p2064_p5 }
  0x3c   : > { %2074 = shalt.err (!%p2071_p6)
}
  0x3d   : > { %s2075_s27 = scalar_lea.vmem %s2299_s26, 1664  ;;  %s2165_s28 = smov [#allocation2]  }
  0x3e   : > { %p2076_p8 = scmp.ne.s32.totalorder %s2299_s26, %s2075_s27  ;;  %s2080_s29 = sshll.u32 %s2165_s28, 4  ;;  %s2081_s29 = int_to_ptr.vmem [resolvable:$false] %s2080_s29 }
  0x3f   : > { %s2082_s23 = scalar_lea.vmem %s2081_s29, 3328  ;;  %p2083_p3 = scmp.lt.s32.totalorder %s2299_s26, %s2081_s29 }
  0x40   : > { %p2078_p10 = pnand %p2076_p8, %p2062_p0  ;;  %p2084_p7 = scmp.lt.s32.totalorder %s2082_s23, %s2075_s27 }
  0x42   : > { %p2079_p13 = pneg %p2078_p10  ;;  %p2085_p9 = por %p2084_p7, %p2083_p3 }
  0x44   : > { %p2086_p2 = pnand %p2085_p9, %p2079_p13 }
  0x46   : > { %2089 = shalt.err (!%p2086_p2)
}
  0x47   : > { %s2166_s30 = smov 128   ;;  %s2167_s25 = smov 8  }
  0x48   : > { %1934 = dma.hbm_to_vmem [thread:$0]  (!%p2295_p11), %s2293_s4, 1664, %s2299_s26, %s2301_s5, %s2166_s30, %s2166_s30, %s2167_s25  }
  0x49   : > { %p2653_p0 = scmp.ne.s32.totalorder %s2648_s20, 0 }
  0x4a   : > { %s2332_s6 = sand.u32 (!%p2653_p0), 1, %s2152_s13   ;;  %p2654_p5 = scmp.ne.s32.totalorder (!%p2653_p0), %s2646_s18, 0 }
  0x4b   : > { %171 = sbr.rel (%p2653_p0) target bundleno = 1499 (0x5db), region = 32  ;;  %s174_s8 = scalar_lea.sflag (!%p2653_p0), [#allocation3], %s2332_s6 }
  0x4c   : > { %s1918_s7 = smul.u32 (!%p2653_p0), 104, %s2332_s6 }
  0x4e   : > { %s2338_s9 = scalar_lea.vmem (!%p2653_p0), [#allocation2], %s1918_s7 }
  0x52   : > { %2135 = dma.done.wait (%p2654_p5), %s174_s8, 1664  }
  0x53   : > { %2137 = vsyncadd (%p2654_p5), %s174_s8, 4294965632  ;;  %p2655_p11 = scmp.eq.s32.totalorder %s2214_s16, 0 }
  0x55   : > { %2139 = dma.done.wait (%p2655_p11), [#allocation6], 6144   ;;  %p2656_p1 = pmov %p2655_p11 }
  0x56   : > { %v2168_v0 = vmov 0.0   ;;  %vm2169_vm0 = vmmov 0   ;;  %v1984_v1 = vld [vmem:[#allocation5] sm:$0xff]   ;;  %v1985_v2 = vld [vmem:[#allocation5 + $0x8] sm:$0xff]   ;;  %v1986_v3 = vld [vmem:[#allocation5 + $0x10] sm:$0xff]   ;;  %s2573_s30 = scalar_lea.vmem [#allocation7], %s1918_s7 }
  0x57   : > { %2141 = vsyncadd (%p2656_p1), [#allocation6], 4294961152  ;;  %1653 = vmatprep.subr.bf16.mxu0 %v2168_v0  ;;  %1669 = vmatprep.mubr.msk.bf16.mxu0 %vm2169_vm0, %v2168_v0  ;;  %v1987_v4 = vld [vmem:[#allocation5 + $0x18] sm:$0xff]   ;;  %v1992_v5 = vld [vmem:[#allocation5 + $0x40] sm:$0xff]   ;;  %s1562_s25 = smul.u32 1664, %s2214_s16  ;;  %s1409_s7 = sshll.u32 %s2573_s30, 4  ;;  %s2594_s7 = int_to_ptr.vmem [resolvable:$true] %s1409_s7 }
  0x58   : > { %1697 = vmatprep.subr.bf16.mxu1 %v2168_v0  ;;  %1713 = vmatprep.mubr.msk.bf16.mxu1 %vm2169_vm0, %v2168_v0  ;;  %v1988_v6 = vld [vmem:[#allocation5 + $0x20] sm:$0xff]   ;;  %v1993_v7 = vld [vmem:[#allocation5 + $0x48] sm:$0xff]   ;;  %v1994_v9 = vld [vmem:[#allocation5 + $0x50] sm:$0xff]   ;;  %s1396_s20 = scalar_lea.sflag [#allocation4], %s2332_s6  ;;  %s2090_s16 = scalar_lea.vmem %s2594_s7, 1664 }
  0x59   : > { %1654 = vmatpush3.bf16.msra.mxu0 %v1984_v1  ;;  %1698 = vmatpush3.bf16.msra.mxu1 %v1992_v5  ;;  %v1989_v8 = vld [vmem:[#allocation5 + $0x28] sm:$0xff]   ;;  %v1990_v10 = vld [vmem:[#allocation5 + $0x30] sm:$0xff]   ;;  %v1995_v11 = vld [vmem:[#allocation5 + $0x58] sm:$0xff]   ;;  %s2592_s18 = scalar_lea.hbm %s2642_s3, %s1562_s25  ;;  %p2091_p4 = scmp.ne.s32.totalorder %s2594_s7, %s2090_s16 }
  0x5a   : > { %1655 = vmatprep.subr.bf16.mxu0 %v2168_v0  ;;  %1699 = vmatprep.subr.bf16.mxu1 %v2168_v0  ;;  %v1991_v12 = vld [vmem:[#allocation5 + $0x38] sm:$0xff]   ;;  %v1996_v15 = vld [vmem:[#allocation5 + $0x60] sm:$0xff]   ;;  %v1997_v17 = vld [vmem:[#allocation5 + $0x68] sm:$0xff]   ;;  %s2170_s4 = smov [#allocation7]  }
  0x5b   : > { %v207_v13 = vld [vmem:[%s2338_s9] sm:$0xff]  ;;  %v208_v14 = vld [vmem:[%s2338_s9 + $0x8] sm:$0xff]  ;;  %v209_v18 = vld [vmem:[%s2338_s9 + $0x10] sm:$0xff]  ;;  %p2092_p6 = pnand %p2091_p4, %p2284_p12  ;;  %s2094_s22 = sshll.u32 %s2170_s4, 4  ;;  %s2095_s22 = int_to_ptr.vmem [resolvable:$false] %s2094_s22 }
  0x5c   : > { %v237_v16 = vpack.c.bf16 %v208_v14, %v207_v13  ;;  %v210_v19 = vld [vmem:[%s2338_s9 + $0x18] sm:$0xff]  ;;  %v211_v21 = vld [vmem:[%s2338_s9 + $0x20] sm:$0xff]  ;;  %v212_v22 = vld [vmem:[%s2338_s9 + $0x28] sm:$0xff]  ;;  %s2096_s26 = scalar_lea.vmem %s2095_s22, 3328  ;;  %p2097_p10 = scmp.lt.s32.totalorder %s2594_s7, %s2095_s22 }
  0x5d   : > { %1656 = vmatpush3.bf16.msra.mxu0 %v1985_v2  ;;  %1700 = vmatpush3.bf16.msra.mxu1 %v1993_v7  ;;  %v238_v20 = vpack.c.bf16 %v210_v19, %v209_v18  ;;  %v239_v23 = vpack.c.bf16 %v212_v22, %v211_v21  ;;  %v213_v24 = vld [vmem:[%s2338_s9 + $0x30] sm:$0xff]  ;;  %v214_v25 = vld [vmem:[%s2338_s9 + $0x38] sm:$0xff]  ;;  %v215_v27 = vld [vmem:[%s2338_s9 + $0x40] sm:$0xff]  ;;  %p2093_p8 = pneg %p2092_p6  ;;  %p2098_p13 = scmp.lt.s32.totalorder %s2096_s26, %s2090_s16 }
  0x5e   : > { %1657 = vmatprep.subr.bf16.mxu0 %v2168_v0  ;;  %1701 = vmatprep.subr.bf16.mxu1 %v2168_v0  ;;  %v240_v26 = vpack.c.bf16 %v214_v25, %v213_v24  ;;  %v216_v28 = vld [vmem:[%s2338_s9 + $0x48] sm:$0xff]  ;;  %v217_v30 = vld [vmem:[%s2338_s9 + $0x50] sm:$0xff]  ;;  %v218_v31 = vld [vmem:[%s2338_s9 + $0x58] sm:$0xff] }
  0x5f   : > { %v241_v29 = vpack.c.bf16 %v216_v28, %v215_v27  ;;  %v242_v32 = vpack.c.bf16 %v218_v31, %v217_v30  ;;  %v219_v33 = vld [vmem:[%s2338_s9 + $0x60] sm:$0xff]  ;;  %v2000_v37 = vld [vmem:[#allocation5 + $0x80] sm:$0xff]   ;;  %v2001_v38 = vld [vmem:[#allocation5 + $0x88] sm:$0xff]   ;;  %p2099_p3 = por %p2098_p13, %p2097_p10 }
  0x60   : > { %v243_v34 = vpack.c.bf16 %v219_v33, %v219_v33  ;;  %v1998_v35 = vld [vmem:[#allocation5 + $0x70] sm:$0xff]   ;;  %v1999_v36 = vld [vmem:[#allocation5 + $0x78] sm:$0xff]   ;;  %v2004_v41 = vld [vmem:[#allocation5 + $0xa0] sm:$0xff]  }
  0x61   : > { %1658 = vmatpush3.bf16.msra.mxu0 %v1986_v3  ;;  %1702 = vmatpush3.bf16.msra.mxu1 %v1994_v9  ;;  %v2002_v39 = vld [vmem:[#allocation5 + $0x90] sm:$0xff]   ;;  %v2003_v40 = vld [vmem:[#allocation5 + $0x98] sm:$0xff]   ;;  %v2005_v42 = vld [vmem:[#allocation5 + $0xa8] sm:$0xff]   ;;  %p2100_p7 = pnand %p2099_p3, %p2093_p8 }
  0x62   : > { %1659 = vmatprep.subr.bf16.mxu0 %v2168_v0  ;;  %1703 = vmatprep.subr.bf16.mxu1 %v2168_v0  ;;  %v2006_v43 = vld [vmem:[#allocation5 + $0xb0] sm:$0xff]  }
  0x63   : > { %v2407_v44 = vld [vmem:[%s2641_s2] ss:$0 sm:$0xff] }
  0x65   : > { %1660 = vmatpush3.bf16.msra.mxu0 %v1987_v4  ;;  %1704 = vmatpush3.bf16.msra.mxu1 %v1995_v11 }
  0x66   : > { %1661 = vmatprep.subr.bf16.mxu0 %v2168_v0  ;;  %1705 = vmatprep.subr.bf16.mxu1 %v2168_v0 }
  0x69   : > { %1662 = vmatpush3.bf16.msra.mxu0 %v1988_v6  ;;  %1706 = vmatpush3.bf16.msra.mxu1 %v1996_v15 }
  0x6a   : > { %1663 = vmatprep.subr.bf16.mxu0 %v2168_v0  ;;  %1707 = vmatprep.subr.bf16.mxu1 %v2168_v0 }
  0x6d   : > { %1664 = vmatpush3.bf16.msra.mxu0 %v1989_v8  ;;  %1708 = vmatpush3.bf16.msra.mxu1 %v1997_v17 }
  0x6e   : > { %1665 = vmatprep.subr.bf16.mxu0 %v2168_v0  ;;  %1709 = vmatprep.subr.bf16.mxu1 %v2168_v0 }
  0x71   : > { %1666 = vmatpush3.bf16.msra.mxu0 %v1990_v10  ;;  %1710 = vmatpush3.bf16.msra.mxu1 %v1998_v35 }
  0x72   : > { %1667 = vmatprep.subr.bf16.mxu0 %v2168_v0  ;;  %1711 = vmatprep.subr.bf16.mxu1 %v2168_v0 }
  0x75   : > { %1668 = vmatpush3.bf16.msra.mxu0 %v1991_v12  ;;  %1712 = vmatpush3.bf16.msra.mxu1 %v1999_v36 }
  0x76   : > { %1741 = vmatprep.subr.bf16.mxu0 %v2168_v0  ;;  %1785 = vmatprep.subr.bf16.mxu1 %v2168_v0 }
  0x78   : > { %1670 = vmatmul.mubr.bf16.vlgmr.msra.gmra.mrb[0].mxu0 %v237_v16 }
  0x79   : > { %1673 = vmatprep.mubr.msk.bf16.mxu0 %vm2169_vm0, %v2168_v0  ;;  %1742 = vmatpush3.bf16.msra.mxu0 %v2000_v37 }
  0x7a   : > { %1743 = vmatprep.subr.bf16.mxu0 %v2168_v0 }
  0x7d   : > { %1744 = vmatpush3.bf16.msra.mxu0 %v2001_v38 }
  0x7e   : > { %1745 = vmatprep.subr.bf16.mxu0 %v2168_v0 }
  0x80   : > { %1674 = vmatmul.mubr.bf16.gmra.mrb[4].mxu0 %v238_v20 }
  0x81   : > { %1677 = vmatprep.mubr.msk.bf16.mxu0 %vm2169_vm0, %v2168_v0  ;;  %1746 = vmatpush3.bf16.msra.mxu0 %v2002_v39 }
  0x82   : > { %1747 = vmatprep.subr.bf16.mxu0 %v2168_v0 }
  0x85   : > { %1748 = vmatpush3.bf16.msra.mxu0 %v2003_v40 }
  0x86   : > { %1749 = vmatprep.subr.bf16.mxu0 %v2168_v0 }
  0x88   : > { %1678 = vmatmul.mubr.bf16.gmra.mrb[8].mxu0 %v239_v23 }
  0x89   : > { %1681 = vmatprep.mubr.msk.bf16.mxu0 %vm2169_vm0, %v2168_v0  ;;  %1750 = vmatpush3.bf16.msra.mxu0 %v2004_v41 }
  0x8a   : > { %1751 = vmatprep.subr.bf16.mxu0 %v2168_v0 }
  0x8d   : > { %1752 = vmatpush3.bf16.msra.mxu0 %v2005_v42 }
  0x8e   : > { %1753 = vmatprep.subr.bf16.mxu0 %v2168_v0 }
  0x90   : > { %1682 = vmatmul.mubr.bf16.gmra.mrb[12].mxu0 %v240_v26 }
  0x91   : > { %1685 = vmatprep.mubr.msk.bf16.mxu0 %vm2169_vm0, %v2168_v0  ;;  %1754 = vmatpush3.bf16.msra.mxu0 %v2006_v43 }
  0x92   : > { %1755 = vmatprep.subr.bf16.mxu0 %v2168_v0 }
  0x98   : > { %1686 = vmatmul.mubr.bf16.gmra.mrb[16].mxu0 %v241_v29 }
  0x99   : > { %1689 = vmatprep.mubr.msk.bf16.mxu0 %vm2169_vm0, %v2168_v0 }
  0xa0   : > { %1690 = vmatmul.mubr.bf16.gmra.mrb[20].mxu0 %v242_v32 }
  0xa1   : > { %1693 = vmatprep.mubr.msk.bf16.mxu0 %vm2169_vm0, %v2168_v0 }
  0xa8   : > { %1694 = vmatmul.mubr.bf16.gmra.mrb[24].mxu0 %v243_v34 }
  0xa9   : > { %1757 = vmatprep.mubr.msk.bf16.mxu0 %vm2169_vm0, %v2168_v0 }
 0x14b   : > { %v332_v45 = vpop.f32.mrb[0].mxu0 }
 0x14c   : > { %v333_v46 = vadd.f32 %v2407_v44, %v332_v45  ;;  %v1671_v47 = vpop.f32.mrb[1].mxu0 }
 0x14d   : > { %v335_v48 = vpop.f32.mrb[2].mxu0 }
 0x14e   : > { %v399_v49 = vmul.f32 0.01, %v333_v46  ;;  %v336_v50 = vadd.f32 %v2407_v44, %v335_v48  ;;  %v1672_v51 = vpop.f32.mrb[3].mxu0  ;;  %vm386_vm1 = vcmp.gt.f32.partialorder %v333_v46, 0.0 }
 0x150   : > { %vm387_vm2 = vcmp.gt.f32.partialorder %v336_v50, 0.0  ;;  %v400_v52 = vmul.f32 0.01, %v336_v50  ;;  %v412_v53 = vsel %vm386_vm1, %v333_v46, %v399_v49 }
 0x152   : > { %v413_v54 = vsel %vm387_vm2, %v336_v50, %v400_v52 }
 0x153   : > { %v340_v55 = vpop.f32.mrb[4].mxu0  ;;  %v444_v56 = vpack.c.bf16 %v413_v54, %v412_v53 }
 0x154   : > { %v341_v57 = vadd.f32 %v2407_v44, %v340_v55  ;;  %v1675_v58 = vpop.f32.mrb[5].mxu0 }
 0x155   : > { %v343_v59 = vpop.f32.mrb[6].mxu0  ;;  %1714 = vmatmul.mubr.bf16.vlgmr.msra.gmra.mrb[0].mxu1 %v444_v56  ;;  %v2009_v58 = vld [vmem:[#allocation5 + $0xc8] sm:$0xff]  }
 0x156   : > { %v401_v60 = vmul.f32 0.01, %v341_v57  ;;  %v344_v61 = vadd.f32 %v2407_v44, %v343_v59  ;;  %v1676_v62 = vpop.f32.mrb[7].mxu0  ;;  %1717 = vmatprep.mubr.msk.bf16.mxu1 %vm2169_vm0, %v2168_v0  ;;  %vm388_vm3 = vcmp.gt.f32.partialorder %v341_v57, 0.0  ;;  %v2010_v59 = vld [vmem:[#allocation5 + $0xd0] sm:$0xff]  }
 0x157   : > { %v2013_v62 = vld [vmem:[#allocation5 + $0xe8] sm:$0xff]  }
 0x158   : > { %vm389_vm4 = vcmp.gt.f32.partialorder %v344_v61, 0.0  ;;  %v402_v63 = vmul.f32 0.01, %v344_v61  ;;  %v414_v1 = vsel %vm388_vm3, %v341_v57, %v401_v60  ;;  %v2007_v57 = vld [vmem:[#allocation5 + $0xb8] sm:$0xff]  }
 0x159   : > { %1756 = vmatpush3.bf16.msra.mxu0 %v2007_v57  ;;  %v2011_v60 = vld [vmem:[#allocation5 + $0xd8] sm:$0xff]  }
 0x15a   : > { %v415_v2 = vsel %vm389_vm4, %v344_v61, %v402_v63  ;;  %1829 = vmatprep.subr.bf16.mxu0 %v2168_v0  ;;  %v2012_v61 = vld [vmem:[#allocation5 + $0xe0] sm:$0xff]   ;;  %v2014_v63 = vld [vmem:[#allocation5 + $0xf0] sm:$0xff]  }
 0x15b   : > { %v348_v3 = vpop.f32.mrb[8].mxu0  ;;  %v445_v4 = vpack.c.bf16 %v415_v2, %v414_v1  ;;  %v2447_v1 = vld [vmem:[%s2641_s2 + $0x1] ss:$0 sm:$0xff] }
 0x15c   : > { %v349_v5 = vadd.f32 %v2407_v44, %v348_v3  ;;  %v1679_v6 = vpop.f32.mrb[9].mxu0 }
 0x15d   : > { %v351_v7 = vpop.f32.mrb[10].mxu0  ;;  %1718 = vmatmul.mubr.bf16.gmra.mrb[4].mxu1 %v445_v4 }
 0x15e   : > { %v403_v8 = vmul.f32 0.01, %v349_v5  ;;  %v352_v9 = vadd.f32 %v2407_v44, %v351_v7  ;;  %v1680_v10 = vpop.f32.mrb[11].mxu0  ;;  %1721 = vmatprep.mubr.msk.bf16.mxu1 %vm2169_vm0, %v2168_v0  ;;  %vm390_vm5 = vcmp.gt.f32.partialorder %v349_v5, 0.0 }
 0x160   : > { %vm391_vm6 = vcmp.gt.f32.partialorder %v352_v9, 0.0  ;;  %v404_v11 = vmul.f32 0.01, %v352_v9  ;;  %v416_v12 = vsel %vm390_vm5, %v349_v5, %v403_v8 }
 0x162   : > { %v417_v13 = vsel %vm391_vm6, %v352_v9, %v404_v11 }
 0x163   : > { %v356_v14 = vpop.f32.mrb[12].mxu0  ;;  %v446_v15 = vpack.c.bf16 %v417_v13, %v416_v12 }
 0x164   : > { %v357_v16 = vadd.f32 %v2407_v44, %v356_v14  ;;  %v1683_v17 = vpop.f32.mrb[13].mxu0 }
 0x165   : > { %v359_v18 = vpop.f32.mrb[14].mxu0  ;;  %1722 = vmatmul.mubr.bf16.gmra.mrb[8].mxu1 %v446_v15 }
 0x166   : > { %v405_v19 = vmul.f32 0.01, %v357_v16  ;;  %v360_v20 = vadd.f32 %v2407_v44, %v359_v18  ;;  %v1684_v21 = vpop.f32.mrb[15].mxu0  ;;  %1725 = vmatprep.mubr.msk.bf16.mxu1 %vm2169_vm0, %v2168_v0  ;;  %vm392_vm7 = vcmp.gt.f32.partialorder %v357_v16, 0.0 }
 0x168   : > { %vm393_vm8 = vcmp.gt.f32.partialorder %v360_v20, 0.0  ;;  %v406_v22 = vmul.f32 0.01, %v360_v20  ;;  %v418_v23 = vsel %vm392_vm7, %v357_v16, %v405_v19 }
 0x16a   : > { %v419_v24 = vsel %vm393_vm8, %v360_v20, %v406_v22 }
 0x16b   : > { %v364_v25 = vpop.f32.mrb[16].mxu0  ;;  %v447_v26 = vpack.c.bf16 %v419_v24, %v418_v23 }
 0x16c   : > { %v365_v27 = vadd.f32 %v2407_v44, %v364_v25  ;;  %v1687_v28 = vpop.f32.mrb[17].mxu0 }
 0x16d   : > { %v367_v29 = vpop.f32.mrb[18].mxu0  ;;  %1726 = vmatmul.mubr.bf16.gmra.mrb[12].mxu1 %v447_v26 }
 0x16e   : > { %v407_v30 = vmul.f32 0.01, %v365_v27  ;;  %v368_v31 = vadd.f32 %v2407_v44, %v367_v29  ;;  %v1688_v32 = vpop.f32.mrb[19].mxu0  ;;  %1729 = vmatprep.mubr.msk.bf16.mxu1 %vm2169_vm0, %v2168_v0  ;;  %vm394_vm9 = vcmp.gt.f32.partialorder %v365_v27, 0.0 }
 0x170   : > { %vm395_vm10 = vcmp.gt.f32.partialorder %v368_v31, 0.0  ;;  %v408_v33 = vmul.f32 0.01, %v368_v31  ;;  %v420_v34 = vsel %vm394_vm9, %v365_v27, %v407_v30 }
 0x172   : > { %v421_v35 = vsel %vm395_vm10, %v368_v31, %v408_v33 }
 0x173   : > { %v372_v36 = vpop.f32.mrb[20].mxu0  ;;  %v448_v37 = vpack.c.bf16 %v421_v35, %v420_v34 }
 0x174   : > { %v373_v38 = vadd.f32 %v2407_v44, %v372_v36  ;;  %v1691_v39 = vpop.f32.mrb[21].mxu0 }
 0x175   : > { %v375_v40 = vpop.f32.mrb[22].mxu0  ;;  %1730 = vmatmul.mubr.bf16.gmra.mrb[16].mxu1 %v448_v37 }
 0x176   : > { %v409_v41 = vmul.f32 0.01, %v373_v38  ;;  %v376_v42 = vadd.f32 %v2407_v44, %v375_v40  ;;  %v1692_v43 = vpop.f32.mrb[23].mxu0  ;;  %1733 = vmatprep.mubr.msk.bf16.mxu1 %vm2169_vm0, %v2168_v0  ;;  %vm396_vm11 = vcmp.gt.f32.partialorder %v373_v38, 0.0 }
 0x178   : > { %vm397_vm12 = vcmp.gt.f32.partialorder %v376_v42, 0.0  ;;  %v410_v45 = vmul.f32 0.01, %v376_v42  ;;  %v422_v46 = vsel %vm396_vm11, %v373_v38, %v409_v41 }
 0x17a   : > { %v423_v47 = vsel %vm397_vm12, %v376_v42, %v410_v45 }
 0x17b   : > { %v449_v48 = vpack.c.bf16 %v423_v47, %v422_v46  ;;  %v380_v49 = vpop.f32.mrb[24].mxu0 }
 0x17c   : > { %v381_v50 = vadd.f32 %v2407_v44, %v380_v49  ;;  %v1695_v51 = vpop.f32.mrb[25].mxu0  ;;  %v2008_v44 = vld [vmem:[#allocation5 + $0xc0] sm:$0xff]  }
 0x17d   : > { %1734 = vmatmul.mubr.bf16.gmra.mrb[20].mxu1 %v449_v48  ;;  %v383_v52 = vpop.f32.mrb[26].mxu0 }
 0x17e   : > { %vm398_vm13 = vcmp.gt.f32.partialorder %v381_v50, 0.0  ;;  %v411_v53 = vmul.f32 0.01, %v381_v50  ;;  %v1696_v54 = vpop.f32.mrb[27].mxu0  ;;  %1737 = vmatprep.mubr.msk.bf16.mxu1 %vm2169_vm0, %v2168_v0  ;;  %1786 = vmatpush3.bf16.msra.mxu1 %v2008_v44 }
 0x17f   : > { %1787 = vmatprep.subr.bf16.mxu1 %v2168_v0 }
 0x180   : > { %v424_v55 = vsel %vm398_vm13, %v381_v50, %v411_v53 }
 0x181   : > { %v450_v56 = vpack.c.bf16 %v424_v55, %v424_v55 }
 0x182   : > { %1788 = vmatpush3.bf16.msra.mxu1 %v2009_v58 }
 0x183   : > { %1789 = vmatprep.subr.bf16.mxu1 %v2168_v0 }
 0x185   : > { %1738 = vmatmul.mubr.bf16.gmra.mrb[24].mxu1 %v450_v56 }
 0x186   : > { %1801 = vmatprep.mubr.msk.bf16.mxu1 %vm2169_vm0, %v2168_v0  ;;  %1790 = vmatpush3.bf16.msra.mxu1 %v2010_v59 }
 0x187   : > { %1791 = vmatprep.subr.bf16.mxu1 %v2168_v0 }
 0x18a   : > { %1792 = vmatpush3.bf16.msra.mxu1 %v2011_v60 }
 0x18b   : > { %1793 = vmatprep.subr.bf16.mxu1 %v2168_v0 }
 0x18e   : > { %1794 = vmatpush3.bf16.msra.mxu1 %v2012_v61 }
 0x18f   : > { %1795 = vmatprep.subr.bf16.mxu1 %v2168_v0 }
 0x192   : > { %1796 = vmatpush3.bf16.msra.mxu1 %v2013_v62 }
 0x193   : > { %1797 = vmatprep.subr.bf16.mxu1 %v2168_v0 }
 0x196   : > { %1798 = vmatpush3.bf16.msra.mxu1 %v2014_v63 }
 0x197   : > { %1799 = vmatprep.subr.bf16.mxu1 %v2168_v0 }
 0x228   : > { %v539_v2 = vpop.f32.mrb[0].mxu1 }
 0x229   : > { %v540_v3 = vadd.f32 %v2447_v1, %v539_v2  ;;  %v1715_v4 = vpop.f32.mrb[1].mxu1 }
 0x22a   : > { %v542_v5 = vpop.f32.mrb[2].mxu1 }
 0x22b   : > { %v606_v6 = vmul.f32 0.01, %v540_v3  ;;  %v543_v7 = vadd.f32 %v2447_v1, %v542_v5  ;;  %v1716_v8 = vpop.f32.mrb[3].mxu1  ;;  %vm593_vm14 = vcmp.gt.f32.partialorder %v540_v3, 0.0 }
 0x22d   : > { %vm594_vm15 = vcmp.gt.f32.partialorder %v543_v7, 0.0  ;;  %v607_v9 = vmul.f32 0.01, %v543_v7  ;;  %v619_v10 = vsel %vm593_vm14, %v540_v3, %v606_v6 }
 0x22f   : > { %v620_v11 = vsel %vm594_vm15, %v543_v7, %v607_v9 }
 0x230   : > { %v651_v12 = vpack.c.bf16 %v620_v11, %v619_v10  ;;  %v547_v13 = vpop.f32.mrb[4].mxu1 }
 0x231   : > { %v548_v14 = vadd.f32 %v2447_v1, %v547_v13  ;;  %v1719_v15 = vpop.f32.mrb[5].mxu1 }
 0x232   : > { %v550_v16 = vpop.f32.mrb[6].mxu1  ;;  %1758 = vmatmul.mubr.bf16.vlgmr.msra.gmra.mrb[28].mxu0 %v651_v12  ;;  %v2017_v15 = vld [vmem:[#allocation5 + $0x108] sm:$0xff]  }
 0x233   : > { %v608_v17 = vmul.f32 0.01, %v548_v14  ;;  %v551_v18 = vadd.f32 %v2447_v1, %v550_v16  ;;  %v1720_v19 = vpop.f32.mrb[7].mxu1  ;;  %1761 = vmatprep.mubr.msk.bf16.mxu0 %vm2169_vm0, %v2168_v0  ;;  %vm595_vm1 = vcmp.gt.f32.partialorder %v548_v14, 0.0  ;;  %v2018_v16 = vld [vmem:[#allocation5 + $0x110] sm:$0xff]  }
 0x234   : > { %v2021_v19 = vld [vmem:[#allocation5 + $0x128] sm:$0xff]  }
 0x235   : > { %vm596_vm2 = vcmp.gt.f32.partialorder %v551_v18, 0.0  ;;  %v609_v20 = vmul.f32 0.01, %v551_v18  ;;  %v621_v21 = vsel %vm595_vm1, %v548_v14, %v608_v17  ;;  %v2015_v14 = vld [vmem:[#allocation5 + $0xf8] sm:$0xff]  }
 0x236   : > { %1800 = vmatpush3.bf16.msra.mxu1 %v2015_v14  ;;  %v2019_v17 = vld [vmem:[#allocation5 + $0x118] sm:$0xff]   ;;  %v2029_v14 = vld [vmem:[#allocation5 + $0x168] sm:$0xff]  }
 0x237   : > { %v622_v22 = vsel %vm596_vm2, %v551_v18, %v609_v20  ;;  %1873 = vmatprep.subr.bf16.mxu1 %v2168_v0  ;;  %v2020_v18 = vld [vmem:[#allocation5 + $0x120] sm:$0xff]   ;;  %v2022_v20 = vld [vmem:[#allocation5 + $0x130] sm:$0xff]  }
 0x238   : > { %v555_v23 = vpop.f32.mrb[8].mxu1  ;;  %v652_v24 = vpack.c.bf16 %v622_v22, %v621_v21  ;;  %v1519_v21 = vld [vmem:[%s2641_s2 + $0x2] ss:$0 sm:$0xff] }
 0x239   : > { %v556_v25 = vadd.f32 %v2447_v1, %v555_v23  ;;  %v1723_v26 = vpop.f32.mrb[9].mxu1 }
 0x23a   : > { %v558_v27 = vpop.f32.mrb[10].mxu1  ;;  %1762 = vmatmul.mubr.bf16.gmra.mrb[32].mxu0 %v652_v24 }
 0x23b   : > { %v610_v28 = vmul.f32 0.01, %v556_v25  ;;  %v559_v29 = vadd.f32 %v2447_v1, %v558_v27  ;;  %v1724_v30 = vpop.f32.mrb[11].mxu1  ;;  %1765 = vmatprep.mubr.msk.bf16.mxu0 %vm2169_vm0, %v2168_v0  ;;  %vm597_vm3 = vcmp.gt.f32.partialorder %v556_v25, 0.0 }
 0x23d   : > { %vm598_vm4 = vcmp.gt.f32.partialorder %v559_v29, 0.0  ;;  %v611_v31 = vmul.f32 0.01, %v559_v29  ;;  %v623_v32 = vsel %vm597_vm3, %v556_v25, %v610_v28 }
 0x23f   : > { %v624_v33 = vsel %vm598_vm4, %v559_v29, %v611_v31 }
 0x240   : > { %v563_v34 = vpop.f32.mrb[12].mxu1  ;;  %v653_v35 = vpack.c.bf16 %v624_v33, %v623_v32 }
 0x241   : > { %v564_v36 = vadd.f32 %v2447_v1, %v563_v34  ;;  %v1727_v37 = vpop.f32.mrb[13].mxu1 }
 0x242   : > { %v566_v38 = vpop.f32.mrb[14].mxu1  ;;  %1766 = vmatmul.mubr.bf16.gmra.mrb[36].mxu0 %v653_v35 }
 0x243   : > { %v612_v39 = vmul.f32 0.01, %v564_v36  ;;  %v567_v40 = vadd.f32 %v2447_v1, %v566_v38  ;;  %v1728_v41 = vpop.f32.mrb[15].mxu1  ;;  %1769 = vmatprep.mubr.msk.bf16.mxu0 %vm2169_vm0, %v2168_v0  ;;  %vm599_vm5 = vcmp.gt.f32.partialorder %v564_v36, 0.0 }
 0x245   : > { %vm600_vm6 = vcmp.gt.f32.partialorder %v567_v40, 0.0  ;;  %v613_v42 = vmul.f32 0.01, %v567_v40  ;;  %v625_v43 = vsel %vm599_vm5, %v564_v36, %v612_v39 }
 0x247   : > { %v626_v45 = vsel %vm600_vm6, %v567_v40, %v613_v42 }
 0x248   : > { %v571_v46 = vpop.f32.mrb[16].mxu1  ;;  %v654_v47 = vpack.c.bf16 %v626_v45, %v625_v43 }
 0x249   : > { %v572_v48 = vadd.f32 %v2447_v1, %v571_v46  ;;  %v1731_v49 = vpop.f32.mrb[17].mxu1 }
 0x24a   : > { %v574_v50 = vpop.f32.mrb[18].mxu1  ;;  %1770 = vmatmul.mubr.bf16.gmra.mrb[40].mxu0 %v654_v47 }
 0x24b   : > { %v614_v51 = vmul.f32 0.01, %v572_v48  ;;  %v575_v52 = vadd.f32 %v2447_v1, %v574_v50  ;;  %v1732_v53 = vpop.f32.mrb[19].mxu1  ;;  %1773 = vmatprep.mubr.msk.bf16.mxu0 %vm2169_vm0, %v2168_v0  ;;  %vm601_vm7 = vcmp.gt.f32.partialorder %v572_v48, 0.0 }
 0x24d   : > { %vm602_vm8 = vcmp.gt.f32.partialorder %v575_v52, 0.0  ;;  %v615_v54 = vmul.f32 0.01, %v575_v52  ;;  %v627_v55 = vsel %vm601_vm7, %v572_v48, %v614_v51 }
 0x24f   : > { %v628_v56 = vsel %vm602_vm8, %v575_v52, %v615_v54 }
 0x250   : > { %v579_v57 = vpop.f32.mrb[20].mxu1  ;;  %v655_v44 = vpack.c.bf16 %v628_v56, %v627_v55 }
 0x251   : > { %v580_v58 = vadd.f32 %v2447_v1, %v579_v57  ;;  %v1735_v59 = vpop.f32.mrb[21].mxu1 }
 0x252   : > { %v582_v60 = vpop.f32.mrb[22].mxu1  ;;  %1774 = vmatmul.mubr.bf16.gmra.mrb[44].mxu0 %v655_v44 }
 0x253   : > { %v616_v61 = vmul.f32 0.01, %v580_v58  ;;  %v583_v62 = vadd.f32 %v2447_v1, %v582_v60  ;;  %v1736_v63 = vpop.f32.mrb[23].mxu1  ;;  %1777 = vmatprep.mubr.msk.bf16.mxu0 %vm2169_vm0, %v2168_v0  ;;  %vm603_vm9 = vcmp.gt.f32.partialorder %v580_v58, 0.0 }
 0x255   : > { %vm604_vm10 = vcmp.gt.f32.partialorder %v583_v62, 0.0  ;;  %v617_v2 = vmul.f32 0.01, %v583_v62  ;;  %v629_v3 = vsel %vm603_vm9, %v580_v58, %v616_v61 }
 0x257   : > { %v630_v4 = vsel %vm604_vm10, %v583_v62, %v617_v2 }
 0x258   : > { %v587_v5 = vpop.f32.mrb[24].mxu1  ;;  %v656_v6 = vpack.c.bf16 %v630_v4, %v629_v3 }
 0x259   : > { %v588_v7 = vadd.f32 %v2447_v1, %v587_v5  ;;  %v1739_v8 = vpop.f32.mrb[25].mxu1  ;;  %v2016_v1 = vld [vmem:[#allocation5 + $0x100] sm:$0xff]  }
 0x25a   : > { %1778 = vmatmul.mubr.bf16.gmra.mrb[48].mxu0 %v656_v6  ;;  %v590_v9 = vpop.f32.mrb[26].mxu1  ;;  %v2023_v8 = vld [vmem:[#allocation5 + $0x138] sm:$0xff]  }
 0x25b   : > { %vm605_vm11 = vcmp.gt.f32.partialorder %v588_v7, 0.0  ;;  %v618_v10 = vmul.f32 0.01, %v588_v7  ;;  %v1740_v11 = vpop.f32.mrb[27].mxu1  ;;  %1781 = vmatprep.mubr.msk.bf16.mxu0 %vm2169_vm0, %v2168_v0  ;;  %1830 = vmatpush3.bf16.msra.mxu0 %v2016_v1  ;;  %v2024_v9 = vld [vmem:[#allocation5 + $0x140] sm:$0xff]   ;;  %v2030_v1 = vld [vmem:[#allocation5 + $0x170] sm:$0xff]  }
 0x25c   : > { %1831 = vmatprep.subr.bf16.mxu0 %v2168_v0  ;;  %v2026_v11 = vld [vmem:[#allocation5 + $0x150] sm:$0xff]  }
 0x25d   : > { %v631_v12 = vsel %vm605_vm11, %v588_v7, %v618_v10  ;;  %v2025_v10 = vld [vmem:[#allocation5 + $0x148] sm:$0xff]  }
 0x25e   : > { %v657_v13 = vpack.c.bf16 %v631_v12, %v631_v12  ;;  %v2027_v12 = vld [vmem:[#allocation5 + $0x158] sm:$0xff]  }
 0x25f   : > { %1832 = vmatpush3.bf16.msra.mxu0 %v2017_v15  ;;  %v2511_v15 = vld [vmem:[%s2641_s2 + $0x3] ss:$0 sm:$0xff] }
 0x260   : > { %1833 = vmatprep.subr.bf16.mxu0 %v2168_v0 }
 0x262   : > { %1782 = vmatmul.mubr.bf16.gmra.mrb[52].mxu0 %v657_v13  ;;  %v2028_v13 = vld [vmem:[#allocation5 + $0x160] sm:$0xff]  }
 0x263   : > { %1845 = vmatprep.mubr.msk.bf16.mxu0 %vm2169_vm0, %v2168_v0  ;;  %1834 = vmatpush3.bf16.msra.mxu0 %v2018_v16 }
 0x264   : > { %1835 = vmatprep.subr.bf16.mxu0 %v2168_v0 }
 0x267   : > { %1836 = vmatpush3.bf16.msra.mxu0 %v2019_v17 }
 0x268   : > { %1837 = vmatprep.subr.bf16.mxu0 %v2168_v0 }
 0x26b   : > { %1838 = vmatpush3.bf16.msra.mxu0 %v2020_v18 }
 0x26c   : > { %1839 = vmatprep.subr.bf16.mxu0 %v2168_v0 }
 0x26f   : > { %1840 = vmatpush3.bf16.msra.mxu0 %v2021_v19 }
 0x270   : > { %1841 = vmatprep.subr.bf16.mxu0 %v2168_v0 }
 0x273   : > { %1842 = vmatpush3.bf16.msra.mxu0 %v2022_v20 }
 0x274   : > { %1843 = vmatprep.subr.bf16.mxu0 %v2168_v0 }
 0x277   : > { %1844 = vmatpush3.bf16.msra.mxu0 %v2023_v8 }
 0x305   : > { %v746_v22 = vpop.f32.mrb[28].mxu0 }
 0x306   : > { %v1759_v23 = vpop.f32.mrb[29].mxu0  ;;  %v747_v25 = vadd.f32 %v1519_v21, %v746_v22 }
 0x307   : > { %v749_v24 = vpop.f32.mrb[30].mxu0 }
 0x308   : > { %v750_v26 = vadd.f32 %v1519_v21, %v749_v24  ;;  %v1760_v27 = vpop.f32.mrb[31].mxu0 }
 0x30a   : > { %v819_v28 = vpack.c.bf16 %v750_v26, %v747_v25 }
 0x30c   : > { %1802 = vmatmul.mubr.bf16.vlgmr.msra.gmra.mrb[28].mxu1 %v819_v28 }
 0x30d   : > { %v754_v29 = vpop.f32.mrb[32].mxu0  ;;  %1805 = vmatprep.mubr.msk.bf16.mxu1 %vm2169_vm0, %v2168_v0  ;;  %1874 = vmatpush3.bf16.msra.mxu1 %v2024_v9 }
 0x30e   : > { %v1763_v30 = vpop.f32.mrb[33].mxu0  ;;  %v755_v32 = vadd.f32 %v1519_v21, %v754_v29  ;;  %1875 = vmatprep.subr.bf16.mxu1 %v2168_v0 }
 0x30f   : > { %v757_v31 = vpop.f32.mrb[34].mxu0 }
 0x310   : > { %v758_v33 = vadd.f32 %v1519_v21, %v757_v31  ;;  %v1764_v34 = vpop.f32.mrb[35].mxu0 }
 0x311   : > { %1876 = vmatpush3.bf16.msra.mxu1 %v2025_v10 }
 0x312   : > { %v820_v35 = vpack.c.bf16 %v758_v33, %v755_v32  ;;  %1877 = vmatprep.subr.bf16.mxu1 %v2168_v0 }
 0x314   : > { %1806 = vmatmul.mubr.bf16.gmra.mrb[32].mxu1 %v820_v35 }
 0x315   : > { %v762_v36 = vpop.f32.mrb[36].mxu0  ;;  %1809 = vmatprep.mubr.msk.bf16.mxu1 %vm2169_vm0, %v2168_v0  ;;  %1878 = vmatpush3.bf16.msra.mxu1 %v2026_v11 }
 0x316   : > { %v1767_v37 = vpop.f32.mrb[37].mxu0  ;;  %v763_v39 = vadd.f32 %v1519_v21, %v762_v36  ;;  %1879 = vmatprep.subr.bf16.mxu1 %v2168_v0 }
 0x317   : > { %v765_v38 = vpop.f32.mrb[38].mxu0 }
 0x318   : > { %v766_v40 = vadd.f32 %v1519_v21, %v765_v38  ;;  %v1768_v41 = vpop.f32.mrb[39].mxu0 }
 0x319   : > { %1880 = vmatpush3.bf16.msra.mxu1 %v2027_v12 }
 0x31a   : > { %v821_v42 = vpack.c.bf16 %v766_v40, %v763_v39  ;;  %1881 = vmatprep.subr.bf16.mxu1 %v2168_v0 }
 0x31c   : > { %1810 = vmatmul.mubr.bf16.gmra.mrb[36].mxu1 %v821_v42 }
 0x31d   : > { %v770_v43 = vpop.f32.mrb[40].mxu0  ;;  %1813 = vmatprep.mubr.msk.bf16.mxu1 %vm2169_vm0, %v2168_v0  ;;  %1882 = vmatpush3.bf16.msra.mxu1 %v2028_v13 }
 0x31e   : > { %v1771_v45 = vpop.f32.mrb[41].mxu0  ;;  %v771_v47 = vadd.f32 %v1519_v21, %v770_v43  ;;  %1883 = vmatprep.subr.bf16.mxu1 %v2168_v0 }
 0x31f   : > { %v773_v46 = vpop.f32.mrb[42].mxu0 }
 0x320   : > { %v774_v48 = vadd.f32 %v1519_v21, %v773_v46  ;;  %v1772_v49 = vpop.f32.mrb[43].mxu0 }
 0x321   : > { %1884 = vmatpush3.bf16.msra.mxu1 %v2029_v14 }
 0x322   : > { %v822_v50 = vpack.c.bf16 %v774_v48, %v771_v47  ;;  %1885 = vmatprep.subr.bf16.mxu1 %v2168_v0 }
 0x324   : > { %1814 = vmatmul.mubr.bf16.gmra.mrb[40].mxu1 %v822_v50 }
 0x325   : > { %v778_v51 = vpop.f32.mrb[44].mxu0  ;;  %1817 = vmatprep.mubr.msk.bf16.mxu1 %vm2169_vm0, %v2168_v0  ;;  %1886 = vmatpush3.bf16.msra.mxu1 %v2030_v1 }
 0x326   : > { %v1775_v52 = vpop.f32.mrb[45].mxu0  ;;  %v779_v54 = vadd.f32 %v1519_v21, %v778_v51  ;;  %1887 = vmatprep.subr.bf16.mxu1 %v2168_v0 }
 0x327   : > { %v781_v53 = vpop.f32.mrb[46].mxu0 }
 0x328   : > { %v782_v55 = vadd.f32 %v1519_v21, %v781_v53  ;;  %v1776_v56 = vpop.f32.mrb[47].mxu0 }
 0x32a   : > { %v823_v57 = vpack.c.bf16 %v782_v55, %v779_v54 }
 0x32c   : > { %1818 = vmatmul.mubr.bf16.gmra.mrb[44].mxu1 %v823_v57 }
 0x32d   : > { %v786_v44 = vpop.f32.mrb[48].mxu0  ;;  %1821 = vmatprep.mubr.msk.bf16.mxu1 %vm2169_vm0, %v2168_v0 }
 0x32e   : > { %v1779_v58 = vpop.f32.mrb[49].mxu0  ;;  %v787_v60 = vadd.f32 %v1519_v21, %v786_v44 }
 0x32f   : > { %v789_v59 = vpop.f32.mrb[50].mxu0 }
 0x330   : > { %v790_v61 = vadd.f32 %v1519_v21, %v789_v59  ;;  %v1780_v62 = vpop.f32.mrb[51].mxu0 }
 0x332   : > { %v824_v63 = vpack.c.bf16 %v790_v61, %v787_v60 }
 0x334   : > { %1822 = vmatmul.mubr.bf16.gmra.mrb[48].mxu1 %v824_v63 }
 0x335   : > { %v794_v2 = vpop.f32.mrb[52].mxu0  ;;  %1825 = vmatprep.mubr.msk.bf16.mxu1 %vm2169_vm0, %v2168_v0 }
 0x336   : > { %v795_v3 = vadd.f32 %v1519_v21, %v794_v2  ;;  %v1783_v4 = vpop.f32.mrb[53].mxu0 }
 0x337   : > { %v797_v5 = vpop.f32.mrb[54].mxu0 }
 0x338   : > { %v825_v6 = vpack.c.bf16 %v795_v3, %v795_v3  ;;  %v1784_v7 = vpop.f32.mrb[55].mxu0 }
 0x33c   : > { %1826 = vmatmul.mubr.bf16.gmra.mrb[52].mxu1 %v825_v6 }
 0x33d   : > { %1889 = vmatprep.mubr.msk.bf16.mxu1 %vm2169_vm0, %v2168_v0 }
 0x3df   : > { %v914_v16 = vpop.f32.mrb[28].mxu1 }
 0x3e0   : > { %v915_v17 = vadd.f32 %v2511_v15, %v914_v16  ;;  %v1803_v18 = vpop.f32.mrb[29].mxu1 }
 0x3e1   : > { %v917_v19 = vpop.f32.mrb[30].mxu1 }
 0x3e2   : > { %v981_v20 = vmul.f32 0.01, %v915_v17  ;;  %v918_v21 = vadd.f32 %v2511_v15, %v917_v19  ;;  %v1804_v22 = vpop.f32.mrb[31].mxu1  ;;  %vm968_vm12 = vcmp.gt.f32.partialorder %v915_v17, 0.0 }
 0x3e4   : > { %vm969_vm13 = vcmp.gt.f32.partialorder %v918_v21, 0.0  ;;  %v982_v23 = vmul.f32 0.01, %v918_v21  ;;  %v994_v24 = vsel %vm968_vm12, %v915_v17, %v981_v20 }
 0x3e6   : > { %v995_v25 = vsel %vm969_vm13, %v918_v21, %v982_v23 }
 0x3e7   : > { %v1026_v26 = vpack.c.bf16 %v995_v25, %v994_v24  ;;  %v922_v27 = vpop.f32.mrb[32].mxu1 }
 0x3e8   : > { %v923_v28 = vadd.f32 %v2511_v15, %v922_v27  ;;  %v1807_v29 = vpop.f32.mrb[33].mxu1 }
 0x3e9   : > { %v925_v30 = vpop.f32.mrb[34].mxu1  ;;  %1846 = vmatmul.mubr.bf16.vlgmr.msra.gmra.mrb[56].mxu0 %v1026_v26  ;;  %v2541_v29 = vld [vmem:[%s2641_s2 + $0x4] ss:$0 sm:$0xff] }
 0x3ea   : > { %v983_v31 = vmul.f32 0.01, %v923_v28  ;;  %v926_v32 = vadd.f32 %v2511_v15, %v925_v30  ;;  %v1808_v33 = vpop.f32.mrb[35].mxu1  ;;  %1849 = vmatprep.mubr.msk.bf16.mxu0 %vm2169_vm0, %v2168_v0  ;;  %vm970_vm14 = vcmp.gt.f32.partialorder %v923_v28, 0.0 }
 0x3ec   : > { %vm971_vm15 = vcmp.gt.f32.partialorder %v926_v32, 0.0  ;;  %v984_v34 = vmul.f32 0.01, %v926_v32  ;;  %v996_v35 = vsel %vm970_vm14, %v923_v28, %v983_v31  ;;  %v2031_v28 = vld [vmem:[#allocation5 + $0x178] sm:$0xff]  }
 0x3ed   : > { %1888 = vmatpush3.bf16.msra.mxu1 %v2031_v28 }
 0x3ee   : > { %v997_v36 = vsel %vm971_vm15, %v926_v32, %v984_v34 }
 0x3ef   : > { %v930_v37 = vpop.f32.mrb[36].mxu1  ;;  %v1027_v38 = vpack.c.bf16 %v997_v36, %v996_v35 }
 0x3f0   : > { %v931_v39 = vadd.f32 %v2511_v15, %v930_v37  ;;  %v1811_v40 = vpop.f32.mrb[37].mxu1 }
 0x3f1   : > { %v933_v41 = vpop.f32.mrb[38].mxu1  ;;  %1850 = vmatmul.mubr.bf16.gmra.mrb[60].mxu0 %v1027_v38 }
 0x3f2   : > { %v985_v42 = vmul.f32 0.01, %v931_v39  ;;  %v934_v43 = vadd.f32 %v2511_v15, %v933_v41  ;;  %v1812_v45 = vpop.f32.mrb[39].mxu1  ;;  %1853 = vmatprep.mubr.msk.bf16.mxu0 %vm2169_vm0, %v2168_v0  ;;  %vm972_vm1 = vcmp.gt.f32.partialorder %v931_v39, 0.0 }
 0x3f4   : > { %vm973_vm2 = vcmp.gt.f32.partialorder %v934_v43, 0.0  ;;  %v986_v46 = vmul.f32 0.01, %v934_v43  ;;  %v998_v47 = vsel %vm972_vm1, %v931_v39, %v985_v42 }
 0x3f6   : > { %v999_v48 = vsel %vm973_vm2, %v934_v43, %v986_v46 }
 0x3f7   : > { %v938_v49 = vpop.f32.mrb[40].mxu1  ;;  %v1028_v50 = vpack.c.bf16 %v999_v48, %v998_v47 }
 0x3f8   : > { %v939_v51 = vadd.f32 %v2511_v15, %v938_v49  ;;  %v1815_v52 = vpop.f32.mrb[41].mxu1 }
 0x3f9   : > { %v941_v53 = vpop.f32.mrb[42].mxu1  ;;  %1854 = vmatmul.mubr.bf16.gmra.mrb[64].mxu0 %v1028_v50 }
 0x3fa   : > { %v987_v54 = vmul.f32 0.01, %v939_v51  ;;  %v942_v55 = vadd.f32 %v2511_v15, %v941_v53  ;;  %v1816_v56 = vpop.f32.mrb[43].mxu1  ;;  %1857 = vmatprep.mubr.msk.bf16.mxu0 %vm2169_vm0, %v2168_v0  ;;  %vm974_vm3 = vcmp.gt.f32.partialorder %v939_v51, 0.0 }
 0x3fc   : > { %vm975_vm4 = vcmp.gt.f32.partialorder %v942_v55, 0.0  ;;  %v988_v57 = vmul.f32 0.01, %v942_v55  ;;  %v1000_v44 = vsel %vm974_vm3, %v939_v51, %v987_v54 }
 0x3fe   : > { %v1001_v58 = vsel %vm975_vm4, %v942_v55, %v988_v57 }
 0x3ff   : > { %v946_v59 = vpop.f32.mrb[44].mxu1  ;;  %v1029_v60 = vpack.c.bf16 %v1001_v58, %v1000_v44 }
 0x400   : > { %v947_v61 = vadd.f32 %v2511_v15, %v946_v59  ;;  %v1819_v62 = vpop.f32.mrb[45].mxu1 }
 0x401   : > { %v949_v63 = vpop.f32.mrb[46].mxu1  ;;  %1858 = vmatmul.mubr.bf16.gmra.mrb[68].mxu0 %v1029_v60 }
 0x402   : > { %v989_v2 = vmul.f32 0.01, %v947_v61  ;;  %v950_v3 = vadd.f32 %v2511_v15, %v949_v63  ;;  %v1820_v4 = vpop.f32.mrb[47].mxu1  ;;  %1861 = vmatprep.mubr.msk.bf16.mxu0 %vm2169_vm0, %v2168_v0  ;;  %vm976_vm5 = vcmp.gt.f32.partialorder %v947_v61, 0.0 }
 0x404   : > { %vm977_vm6 = vcmp.gt.f32.partialorder %v950_v3, 0.0  ;;  %v990_v5 = vmul.f32 0.01, %v950_v3  ;;  %v1002_v6 = vsel %vm976_vm5, %v947_v61, %v989_v2 }
 0x406   : > { %v1003_v7 = vsel %vm977_vm6, %v950_v3, %v990_v5 }
 0x407   : > { %v954_v8 = vpop.f32.mrb[48].mxu1  ;;  %v1030_v9 = vpack.c.bf16 %v1003_v7, %v1002_v6 }
 0x408   : > { %v955_v10 = vadd.f32 %v2511_v15, %v954_v8  ;;  %v1823_v11 = vpop.f32.mrb[49].mxu1 }
 0x409   : > { %v957_v12 = vpop.f32.mrb[50].mxu1  ;;  %1862 = vmatmul.mubr.bf16.gmra.mrb[72].mxu0 %v1030_v9 }
 0x40a   : > { %v991_v13 = vmul.f32 0.01, %v955_v10  ;;  %v958_v14 = vadd.f32 %v2511_v15, %v957_v12  ;;  %v1824_v1 = vpop.f32.mrb[51].mxu1  ;;  %1865 = vmatprep.mubr.msk.bf16.mxu0 %vm2169_vm0, %v2168_v0  ;;  %vm978_vm7 = vcmp.gt.f32.partialorder %v955_v10, 0.0 }
 0x40c   : > { %vm979_vm8 = vcmp.gt.f32.partialorder %v958_v14, 0.0  ;;  %v992_v16 = vmul.f32 0.01, %v958_v14  ;;  %v1004_v17 = vsel %vm978_vm7, %v955_v10, %v991_v13 }
 0x40e   : > { %v1005_v18 = vsel %vm979_vm8, %v958_v14, %v992_v16 }
 0x40f   : > { %v962_v19 = vpop.f32.mrb[52].mxu1  ;;  %v1031_v20 = vpack.c.bf16 %v1005_v18, %v1004_v17 }
 0x410   : > { %v963_v21 = vadd.f32 %v2511_v15, %v962_v19  ;;  %v1827_v22 = vpop.f32.mrb[53].mxu1 }
 0x411   : > { %v965_v23 = vpop.f32.mrb[54].mxu1  ;;  %1866 = vmatmul.mubr.bf16.gmra.mrb[76].mxu0 %v1031_v20 }
 0x412   : > { %vm980_vm9 = vcmp.gt.f32.partialorder %v963_v21, 0.0  ;;  %v993_v24 = vmul.f32 0.01, %v963_v21  ;;  %v1828_v25 = vpop.f32.mrb[55].mxu1  ;;  %1869 = vmatprep.mubr.msk.bf16.mxu0 %vm2169_vm0, %v2168_v0 }
 0x414   : > { %v1006_v26 = vsel %vm980_vm9, %v963_v21, %v993_v24 }
 0x415   : > { %v1032_v27 = vpack.c.bf16 %v1006_v26, %v1006_v26 }
 0x419   : > { %1870 = vmatmul.mubr.bf16.gmra.mrb[80].mxu0 %v1032_v27 }
 0x4bc   : > { %v1121_v15 = vpop.f32.mrb[56].mxu0 }
 0x4bd   : > { %v1122_v30 = vadd.f32 %v2541_v29, %v1121_v15  ;;  %v1847_v31 = vpop.f32.mrb[57].mxu0 }
 0x4be   : > { %v1124_v32 = vpop.f32.mrb[58].mxu0 }
 0x4bf   : > { %v1188_v33 = vmul.f32 0.01, %v1122_v30  ;;  %v1125_v34 = vadd.f32 %v2541_v29, %v1124_v32  ;;  %v1848_v35 = vpop.f32.mrb[59].mxu0  ;;  %vm1175_vm10 = vcmp.gt.f32.partialorder %v1122_v30, 0.0 }
 0x4c1   : > { %vm1176_vm11 = vcmp.gt.f32.partialorder %v1125_v34, 0.0  ;;  %v1189_v36 = vmul.f32 0.01, %v1125_v34  ;;  %v1201_v37 = vsel %vm1175_vm10, %v1122_v30, %v1188_v33 }
 0x4c3   : > { %v1202_v38 = vsel %vm1176_vm11, %v1125_v34, %v1189_v36 }
 0x4c4   : > { %v1233_v39 = vpack.c.bf16 %v1202_v38, %v1201_v37  ;;  %v1129_v40 = vpop.f32.mrb[60].mxu0 }
 0x4c5   : > { %v1130_v41 = vadd.f32 %v2541_v29, %v1129_v40  ;;  %v1851_v42 = vpop.f32.mrb[61].mxu0 }
 0x4c6   : > { %v1132_v43 = vpop.f32.mrb[62].mxu0  ;;  %1890 = vmatmul.mubr.bf16.vlgmr.msra.gmra.mrb[56].mxu1 %v1233_v39 }
 0x4c7   : > { %v1190_v45 = vmul.f32 0.01, %v1130_v41  ;;  %v1133_v46 = vadd.f32 %v2541_v29, %v1132_v43  ;;  %v1852_v47 = vpop.f32.mrb[63].mxu0  ;;  %1893 = vmatprep.mubr.msk.bf16.mxu1 %vm2169_vm0, %v2168_v0  ;;  %vm1177_vm12 = vcmp.gt.f32.partialorder %v1130_v41, 0.0 }
 0x4c9   : > { %vm1178_vm13 = vcmp.gt.f32.partialorder %v1133_v46, 0.0  ;;  %v1191_v48 = vmul.f32 0.01, %v1133_v46  ;;  %v1203_v49 = vsel %vm1177_vm12, %v1130_v41, %v1190_v45  ;;  %v1549_v41 = vld [vmem:[%s2641_s2 + $0x5] ss:$0 sm:$0xff] }
 0x4cb   : > { %v1204_v50 = vsel %vm1178_vm13, %v1133_v46, %v1191_v48 }
 0x4cc   : > { %v1137_v51 = vpop.f32.mrb[64].mxu0  ;;  %v1234_v52 = vpack.c.bf16 %v1204_v50, %v1203_v49 }
 0x4cd   : > { %v1138_v53 = vadd.f32 %v2541_v29, %v1137_v51  ;;  %v1855_v54 = vpop.f32.mrb[65].mxu0 }
 0x4ce   : > { %v1140_v55 = vpop.f32.mrb[66].mxu0  ;;  %1894 = vmatmul.mubr.bf16.gmra.mrb[60].mxu1 %v1234_v52 }
 0x4cf   : > { %v1192_v56 = vmul.f32 0.01, %v1138_v53  ;;  %v1141_v57 = vadd.f32 %v2541_v29, %v1140_v55  ;;  %v1856_v44 = vpop.f32.mrb[67].mxu0  ;;  %1897 = vmatprep.mubr.msk.bf16.mxu1 %vm2169_vm0, %v2168_v0  ;;  %vm1179_vm14 = vcmp.gt.f32.partialorder %v1138_v53, 0.0 }
 0x4d1   : > { %vm1180_vm15 = vcmp.gt.f32.partialorder %v1141_v57, 0.0  ;;  %v1193_v58 = vmul.f32 0.01, %v1141_v57  ;;  %v1205_v59 = vsel %vm1179_vm14, %v1138_v53, %v1192_v56 }
 0x4d3   : > { %v1206_v60 = vsel %vm1180_vm15, %v1141_v57, %v1193_v58 }
 0x4d4   : > { %v1145_v61 = vpop.f32.mrb[68].mxu0  ;;  %v1235_v62 = vpack.c.bf16 %v1206_v60, %v1205_v59 }
 0x4d5   : > { %v1146_v63 = vadd.f32 %v2541_v29, %v1145_v61  ;;  %v1859_v2 = vpop.f32.mrb[69].mxu0 }
 0x4d6   : > { %v1148_v3 = vpop.f32.mrb[70].mxu0  ;;  %1898 = vmatmul.mubr.bf16.gmra.mrb[64].mxu1 %v1235_v62 }
 0x4d7   : > { %v1194_v4 = vmul.f32 0.01, %v1146_v63  ;;  %v1149_v5 = vadd.f32 %v2541_v29, %v1148_v3  ;;  %v1860_v6 = vpop.f32.mrb[71].mxu0  ;;  %1901 = vmatprep.mubr.msk.bf16.mxu1 %vm2169_vm0, %v2168_v0  ;;  %vm1181_vm1 = vcmp.gt.f32.partialorder %v1146_v63, 0.0 }
 0x4d9   : > { %vm1182_vm2 = vcmp.gt.f32.partialorder %v1149_v5, 0.0  ;;  %v1195_v7 = vmul.f32 0.01, %v1149_v5  ;;  %v1207_v8 = vsel %vm1181_vm1, %v1146_v63, %v1194_v4 }
 0x4db   : > { %v1208_v9 = vsel %vm1182_vm2, %v1149_v5, %v1195_v7 }
 0x4dc   : > { %v1153_v10 = vpop.f32.mrb[72].mxu0  ;;  %v1236_v11 = vpack.c.bf16 %v1208_v9, %v1207_v8 }
 0x4dd   : > { %v1154_v12 = vadd.f32 %v2541_v29, %v1153_v10  ;;  %v1863_v13 = vpop.f32.mrb[73].mxu0 }
 0x4de   : > { %v1156_v14 = vpop.f32.mrb[74].mxu0  ;;  %1902 = vmatmul.mubr.bf16.gmra.mrb[68].mxu1 %v1236_v11 }
 0x4df   : > { %v1196_v1 = vmul.f32 0.01, %v1154_v12  ;;  %v1157_v16 = vadd.f32 %v2541_v29, %v1156_v14  ;;  %v1864_v17 = vpop.f32.mrb[75].mxu0  ;;  %1905 = vmatprep.mubr.msk.bf16.mxu1 %vm2169_vm0, %v2168_v0  ;;  %vm1183_vm3 = vcmp.gt.f32.partialorder %v1154_v12, 0.0 }
 0x4e1   : > { %vm1184_vm4 = vcmp.gt.f32.partialorder %v1157_v16, 0.0  ;;  %v1197_v18 = vmul.f32 0.01, %v1157_v16  ;;  %v1209_v19 = vsel %vm1183_vm3, %v1154_v12, %v1196_v1 }
 0x4e3   : > { %v1210_v20 = vsel %vm1184_vm4, %v1157_v16, %v1197_v18 }
 0x4e4   : > { %v1161_v21 = vpop.f32.mrb[76].mxu0  ;;  %v1237_v22 = vpack.c.bf16 %v1210_v20, %v1209_v19 }
 0x4e5   : > { %v1162_v23 = vadd.f32 %v2541_v29, %v1161_v21  ;;  %v1867_v24 = vpop.f32.mrb[77].mxu0 }
 0x4e6   : > { %v1164_v25 = vpop.f32.mrb[78].mxu0  ;;  %1906 = vmatmul.mubr.bf16.gmra.mrb[72].mxu1 %v1237_v22 }
 0x4e7   : > { %v1198_v26 = vmul.f32 0.01, %v1162_v23  ;;  %v1165_v27 = vadd.f32 %v2541_v29, %v1164_v25  ;;  %v1868_v28 = vpop.f32.mrb[79].mxu0  ;;  %1909 = vmatprep.mubr.msk.bf16.mxu1 %vm2169_vm0, %v2168_v0  ;;  %vm1185_vm5 = vcmp.gt.f32.partialorder %v1162_v23, 0.0 }
 0x4e9   : > { %vm1186_vm6 = vcmp.gt.f32.partialorder %v1165_v27, 0.0  ;;  %v1199_v15 = vmul.f32 0.01, %v1165_v27  ;;  %v1211_v30 = vsel %vm1185_vm5, %v1162_v23, %v1198_v26 }
 0x4eb   : > { %v1212_v31 = vsel %vm1186_vm6, %v1165_v27, %v1199_v15 }
 0x4ec   : > { %v1169_v32 = vpop.f32.mrb[80].mxu0  ;;  %v1238_v33 = vpack.c.bf16 %v1212_v31, %v1211_v30 }
 0x4ed   : > { %v1170_v34 = vadd.f32 %v2541_v29, %v1169_v32  ;;  %v1871_v35 = vpop.f32.mrb[81].mxu0 }
 0x4ee   : > { %v1172_v36 = vpop.f32.mrb[82].mxu0  ;;  %1910 = vmatmul.mubr.bf16.gmra.mrb[76].mxu1 %v1238_v33 }
 0x4ef   : > { %vm1187_vm7 = vcmp.gt.f32.partialorder %v1170_v34, 0.0  ;;  %v1200_v37 = vmul.f32 0.01, %v1170_v34  ;;  %v1872_v38 = vpop.f32.mrb[83].mxu0  ;;  %1913 = vmatprep.mubr.msk.bf16.mxu1 %vm2169_vm0, %v2168_v0 }
 0x4f1   : > { %v1213_v39 = vsel %vm1187_vm7, %v1170_v34, %v1200_v37 }
 0x4f2   : > { %v1239_v40 = vpack.c.bf16 %v1213_v39, %v1213_v39 }
 0x4f6   : > { %1914 = vmatmul.mubr.bf16.gmra.mrb[80].mxu1 %v1239_v40 }
 0x599   : > { %v1328_v42 = vpop.f32.mrb[56].mxu1 }
 0x59a   : > { %v1329_v43 = vadd.f32 %v1549_v41, %v1328_v42  ;;  %v1891_v29 = vpop.f32.mrb[57].mxu1 }
 0x59b   : > { %v1331_v45 = vpop.f32.mrb[58].mxu1 }
 0x59c   : > { %1382 = vst [vmem:[%s2573_s30] sm:$0xff] %v1329_v43  ;;  %v1332_v0 = vadd.f32 %v1549_v41, %v1331_v45  ;;  %v1892_v46 = vpop.f32.mrb[59].mxu1 }
 0x59e   : > { %1383 = vst [vmem:[%s2573_s30 + $0x8] sm:$0xff] %v1332_v0 }
 0x5a1   : > { %v1336_v47 = vpop.f32.mrb[60].mxu1 }
 0x5a2   : > { %v1337_v48 = vadd.f32 %v1549_v41, %v1336_v47  ;;  %v1895_v49 = vpop.f32.mrb[61].mxu1 }
 0x5a3   : > { %v1339_v50 = vpop.f32.mrb[62].mxu1 }
 0x5a4   : > { %1384 = vst [vmem:[%s2573_s30 + $0x10] sm:$0xff] %v1337_v48  ;;  %v1340_v51 = vadd.f32 %v1549_v41, %v1339_v50  ;;  %v1896_v52 = vpop.f32.mrb[63].mxu1 }
 0x5a6   : > { %1385 = vst [vmem:[%s2573_s30 + $0x18] sm:$0xff] %v1340_v51 }
 0x5a9   : > { %v1344_v53 = vpop.f32.mrb[64].mxu1 }
 0x5aa   : > { %v1345_v54 = vadd.f32 %v1549_v41, %v1344_v53  ;;  %v1899_v55 = vpop.f32.mrb[65].mxu1 }
 0x5ab   : > { %v1347_v56 = vpop.f32.mrb[66].mxu1 }
 0x5ac   : > { %1386 = vst [vmem:[%s2573_s30 + $0x20] sm:$0xff] %v1345_v54  ;;  %v1348_v57 = vadd.f32 %v1549_v41, %v1347_v56  ;;  %v1900_v44 = vpop.f32.mrb[67].mxu1 }
 0x5ae   : > { %1387 = vst [vmem:[%s2573_s30 + $0x28] sm:$0xff] %v1348_v57 }
 0x5b1   : > { %v1352_v58 = vpop.f32.mrb[68].mxu1 }
 0x5b2   : > { %v1353_v59 = vadd.f32 %v1549_v41, %v1352_v58  ;;  %v1903_v60 = vpop.f32.mrb[69].mxu1 }
 0x5b3   : > { %v1355_v61 = vpop.f32.mrb[70].mxu1 }
 0x5b4   : > { %1388 = vst [vmem:[%s2573_s30 + $0x30] sm:$0xff] %v1353_v59  ;;  %v1356_v62 = vadd.f32 %v1549_v41, %v1355_v61  ;;  %v1904_v63 = vpop.f32.mrb[71].mxu1 }
 0x5b6   : > { %1389 = vst [vmem:[%s2573_s30 + $0x38] sm:$0xff] %v1356_v62 }
 0x5b9   : > { %v1360_v2 = vpop.f32.mrb[72].mxu1 }
 0x5ba   : > { %v1361_v3 = vadd.f32 %v1549_v41, %v1360_v2  ;;  %v1907_v4 = vpop.f32.mrb[73].mxu1 }
 0x5bb   : > { %v1363_v5 = vpop.f32.mrb[74].mxu1 }
 0x5bc   : > { %1390 = vst [vmem:[%s2573_s30 + $0x40] sm:$0xff] %v1361_v3  ;;  %v1364_v6 = vadd.f32 %v1549_v41, %v1363_v5  ;;  %v1908_v7 = vpop.f32.mrb[75].mxu1 }
 0x5be   : > { %1391 = vst [vmem:[%s2573_s30 + $0x48] sm:$0xff] %v1364_v6 }
 0x5c1   : > { %v1368_v8 = vpop.f32.mrb[76].mxu1 }
 0x5c2   : > { %v1369_v9 = vadd.f32 %v1549_v41, %v1368_v8  ;;  %v1911_v10 = vpop.f32.mrb[77].mxu1 }
 0x5c3   : > { %v1371_v11 = vpop.f32.mrb[78].mxu1 }
 0x5c4   : > { %1392 = vst [vmem:[%s2573_s30 + $0x50] sm:$0xff] %v1369_v9  ;;  %v1372_v12 = vadd.f32 %v1549_v41, %v1371_v11  ;;  %v1912_v13 = vpop.f32.mrb[79].mxu1 }
 0x5c6   : > { %1393 = vst [vmem:[%s2573_s30 + $0x58] sm:$0xff] %v1372_v12 }
 0x5c9   : > { %v1376_v14 = vpop.f32.mrb[80].mxu1 }
 0x5ca   : > { %v1377_v1 = vadd.f32 %v1549_v41, %v1376_v14  ;;  %v1915_v16 = vpop.f32.mrb[81].mxu1 }
 0x5cb   : > { %v1379_v17 = vpop.f32.mrb[82].mxu1 }
 0x5cc   : > { %1394 = vst [vmem:[%s2573_s30 + $0x60] sm:$0xff] %v1377_v1  ;;  %v1916_v18 = vpop.f32.mrb[83].mxu1 }
 0x5cd   : > { %2103 = shalt.err (!%p2100_p7)
}
 0x5ce   : > { %s2104_s5 = scalar_lea.hbm %s2592_s18, 1664  ;;  %s2108_s27 = scalar_lea.hbm %s2642_s3, 3328 }
 0x5cf   : > { %p2105_p9 = scmp.ne.s32.totalorder %s2592_s18, %s2104_s5  ;;  %p2109_p5 = scmp.lt.u32.totalorder %s2592_s18, %s2642_s3 }
 0x5d0   : > { %p2110_p11 = scmp.lt.u32.totalorder %s2108_s27, %s2104_s5  ;;  %p2112_p4 = scmp.lt.u32.totalorder %s2104_s5, %s2592_s18 }
 0x5d1   : > { %p2106_p2 = pnand %p2105_p9, %p2284_p12 }
 0x5d2   : > { %p2111_p1 = por %p2110_p11, %p2109_p5 }
 0x5d3   : > { %p2107_p0 = pneg %p2106_p2 }
 0x5d4   : > { %p2113_p6 = por %p2112_p4, %p2111_p1 }
 0x5d6   : > { %p2114_p8 = pnand %p2113_p6, %p2107_p0 }
 0x5d8   : > { %2117 = shalt.err (!%p2114_p8)
}
 0x5d9   : > { %s2171_s23 = smov 128   ;;  %s2172_s30 = smov 8  }
 0x5da   : > { %1925 = dma.vmem_to_hbm [thread:$0]  (%p2284_p12), %s2594_s7, 1664, %s2592_s18, %s1396_s20, %s2171_s23, %s2171_s23, %s2172_s30  }
 0x5db PF: > { %s1424_s25 = sand.u32 1, %s2148_s12   ;;  %p2657_p10 = scmp.ne.s32.totalorder %s2647_s19, 0 }
 0x5dc   : > { %p2658_p13 = scmp.ge.s32.totalorder %s2160_s15, 2  ;;  %s1425_s8 = scalar_lea.sflag [#allocation4], %s1424_s25 }
 0x5de   : > { %p1936_p3 = pnand %p2658_p13, %p2657_p10 }
 0x5e0   : > { %2143 = dma.done.wait (!%p1936_p3), %s1425_s8, 1664  }
 0x5e1   : > { %2145 = vsyncadd (!%p1936_p3), %s1425_s8, 4294965632  ;;  %p17_p7 = scmp.ge.s32.totalorder %s2249_s24, 4   ;;  %s2659_s12 = smov %s2152_s13 }
 0x5e2   : > { %s2660_s13 = smov %s2156_s14  ;;  %s2661_s14 = smov %s2280_s17 }
 0x5e3   : > { %s2662_s15 = smov %s2249_s24  ;;  %19 = sbr.rel (!%p17_p7) target bundleno = 6 (0x6), region = 91 }
 0x5ea   :  { %1430 = vsyncpa [#allocation3], 1 }
 0x5eb   :  { %1432 = vsyncpa [#allocation3 + $0x1], 1 }
 0x5ec   :  { %1433 = vsyncpa [#allocation6], 1 }
 0x5ed   :  { %1434 = vsyncpa [#allocation4], 1 }
 0x5ee   :  { %1436 = vsyncpa [#allocation4 + $0x1], 1 }

</bundles_post_ra>
